<compile_context>
chip_gen: v6e
topology: v6e:2x2x1
jax: 0.10.0
libtpu: 0.0.40
codegen_flags: <defaults>
</compile_context>

<pallas_src>
import jax
import jax.numpy as jnp
from jax.experimental import pallas as pl
from jax.experimental.pallas import tpu as pltpu

MAX_DEGREE = 10                 # PyG MFConv(max_degree=10)
NUM_DEG = MAX_DEGREE + 1        # degree buckets 0..10


# --------------------------------------------------------------------------
# Fused Pallas kernel: embed -> [ReLU? -> MFConv] x C -> add-pool -> head
# --------------------------------------------------------------------------
def gnn_no_rel_kernel(x_ref, adj_ref, deg1h_ref, pool_ref,
                      we_ref, be_ref,
                      wlr_ref, bl_ref,
                      w1_ref, b1_ref, w2_ref, b2_ref,
                      out_ref):
    f32 = jnp.float32
    bf16 = jnp.bfloat16

    # node embedding: x @ We + be (bf16 operands, f32 accumulate)
    h = jnp.dot(x_ref[...], we_ref[...], preferred_element_type=f32) + be_ref[...]

    adj = adj_ref[...]                      # (Npad, Npad) bf16, adj[i, j] = 1 iff edge j -> i
    deg1h = deg1h_ref[...].astype(f32)      # (Npad, DEGPAD) exact 0/1 one-hot of clamped in-degree

    num_blocks = wlr_ref.shape[0]           # static
    num_deg = wlr_ref.shape[1]              # static (= NUM_DEG)

    # GNN stack: [Identity, MFConv_0, ReLU, MFConv_1, ReLU, MFConv_2, ...]
    for c in range(num_blocks):             # static unroll (depth is small)
        if c > 0:
            h = jnp.maximum(h, 0.0)         # nn.ReLU between blocks
        # MFConv: out_i = lins_l[deg_i](sum_j x_j) + lins_r[deg_i](x_i) + b_l[deg_i]
        agg = jnp.dot(adj, h.astype(bf16), preferred_element_type=f32)   # (N, H)
        # K=256 stacked operand [agg ; h]: one full-width MXU pass per degree bucket.
        ah = jnp.concatenate([agg, h], axis=1).astype(bf16)              # (N, 2H)
        new_h = jnp.zeros_like(h)
        for d in range(num_deg):            # static unroll over degree buckets
            sel = deg1h[:, d:d + 1]         # exact 0/1 mask, (N, 1)
            pd = jnp.dot(ah, wlr_ref[c, d], preferred_element_type=f32)  # (N, H)
            # bias folded into the masked VPU accumulate (no K=16 MXU pass)
            new_h = new_h + sel * (pd + bl_ref[c, d])
        h = new_h

    # global_add_pool as a (B, N) x (N, H) matmul, then Linear -> ReLU -> Linear
    pooled = jnp.dot(pool_ref[...], h.astype(bf16), preferred_element_type=f32)
    y = jnp.maximum(
        jnp.dot(pooled.astype(bf16), w1_ref[...], preferred_element_type=f32) + b1_ref[...],
        0.0)
    out_ref[...] = jnp.dot(y.astype(bf16), w2_ref[...], preferred_element_type=f32) + b2_ref[...]


def gnn_no_rel_forward(x_p, adj_p, deg1h_p, pool_p, pk, n_graphs):
    args = (x_p, adj_p, deg1h_p, pool_p,
            pk["We"], pk["be"], pk["Wlr"], pk["Bl"],
            pk["W1"], pk["b1"], pk["W2"], pk["b2"])
    bpad = pool_p.shape[0]
    outpad = pk["W2"].shape[1]
    out = pl.pallas_call(
        gnn_no_rel_kernel,
        out_shape=jax.ShapeDtypeStruct((bpad, outpad), jnp.float32),
        in_specs=[pl.BlockSpec(memory_space=pltpu.MemorySpace.VMEM)] * len(args),
        out_specs=pl.BlockSpec(memory_space=pltpu.MemorySpace.VMEM),
        compiler_params=pltpu.CompilerParams(vmem_limit_bytes=48 * 1024 * 1024),
    )(*args)
    # lane-dense (Bpad, 128) f32 kernel output -> logical (B, 1)
    return out[:n_graphs, :1]


# --------------------------------------------------------------------------
# Pure-JAX reference (unpadded, f32, mirrors PyG MFConv semantics)
# --------------------------------------------------------------------------
def reference_forward(x, adj, deg, pool, params):
    h = x @ params["We"] + params["be"]
    onehot = jax.nn.one_hot(deg, NUM_DEG, dtype=jnp.float32)
    for c, conv in enumerate(params["convs"]):
        if c > 0:
            h = jnp.maximum(h, 0.0)
        agg = adj @ h
        out_l = jnp.einsum("nh,dhk->ndk", agg, conv["Wl"])
        out_r = jnp.einsum("nh,dhk->ndk", h, conv["Wr"])
        h = jnp.einsum("ndk,nd->nk", out_l + out_r, onehot) + onehot @ conv["bl"]
    pooled = pool @ h
    y = jnp.maximum(pooled @ params["W1"] + params["b1"], 0.0)
    return y @ params["W2"] + params["b2"]


# --------------------------------------------------------------------------
# Parameter init (PyTorch-style uniform(+-1/sqrt(fan_in)))
# --------------------------------------------------------------------------
def init_params(key, n_node_features, n_hidden, num_conv_blocks):
    def lin(k, fan_in, fan_out, bias=True):
        kw, kb = jax.random.split(k)
        s = 1.0 / float(fan_in) ** 0.5
        w = jax.random.uniform(kw, (fan_in, fan_out), jnp.float32, -s, s)
        b = jax.random.uniform(kb, (fan_out,), jnp.float32, -s, s) if bias else None
        return w, b

    keys = jax.random.split(key, 3 + num_conv_blocks)
    we, be = lin(keys[0], n_node_features, n_hidden)
    convs = []
    for c in range(num_conv_blocks):
        ck = jax.random.split(keys[3 + c], 2 * NUM_DEG)
        wl, bl, wr = [], [], []
        for d in range(NUM_DEG):
            w, b = lin(ck[2 * d], n_hidden, n_hidden, bias=True)        # lins_l[d]
            wl.append(w); bl.append(b)
            w2, _ = lin(ck[2 * d + 1], n_hidden, n_hidden, bias=False)  # lins_r[d]
            wr.append(w2)
        convs.append(dict(Wl=jnp.stack(wl), bl=jnp.stack(bl), Wr=jnp.stack(wr)))
    w1, b1 = lin(keys[1], n_hidden, n_hidden)
    w2, b2 = lin(keys[2], n_hidden, 1)
    return dict(We=we, be=be, convs=convs, W1=w1, b1=b1, W2=w2, b2=b2)


# --------------------------------------------------------------------------
# Host-side padding / packing into lane-dense bf16 slabs
# --------------------------------------------------------------------------
def _round_up(v, m):
    return ((v + m - 1) // m) * m


def pack_inputs_and_params(x, adj, deg, pool, params, *, hpad=128, outpad=128, degpad=16):
    f32, bf16 = jnp.float32, jnp.bfloat16
    n, f = x.shape
    b = pool.shape[0]
    # bf16 sublane packing = 16 rows per vreg -> pad second-minor dims to 16
    npad = _round_up(n, 16)
    fpad = _round_up(f, 16)
    bpad = _round_up(b, 16)
    h_log = params["We"].shape[1]
    n_blocks = len(params["convs"])

    # activations + 0/1 structural matrices in bf16 (0/1 exact in bf16)
    x_p = jnp.zeros((npad, fpad), f32).at[:n, :f].set(x).astype(bf16)
    adj_p = jnp.zeros((npad, npad), f32).at[:n, :n].set(adj).astype(bf16)
    deg1h = jax.nn.one_hot(deg, degpad, dtype=f32)
    deg1h_p = jnp.zeros((npad, degpad), f32).at[:n].set(deg1h).astype(bf16)
    pool_p = jnp.zeros((bpad, npad), f32).at[:b, :n].set(pool).astype(bf16)

    # weights bf16, biases f32 (added post-accumulation)
    we_p = jnp.zeros((fpad, hpad), f32).at[:f, :h_log].set(params["We"]).astype(bf16)
    be_p = jnp.zeros((1, hpad), f32).at[0, :h_log].set(params["be"])

    # per (block, degree) stacked [Wl ; Wr] slab: contraction dim 2*hpad = 256
    wlr_p = jnp.zeros((n_blocks, NUM_DEG, 2 * hpad, hpad), f32)
    bl_p = jnp.zeros((n_blocks, NUM_DEG, 1, hpad), f32)
    for ci, conv in enumerate(params["convs"]):
        for d in range(NUM_DEG):
            wlr_p = wlr_p.at[ci, d, :h_log, :h_log].set(conv["Wl"][d])
            wlr_p = wlr_p.at[ci, d, hpad:hpad + h_log, :h_log].set(conv["Wr"][d])
            bl_p = bl_p.at[ci, d, 0, :h_log].set(conv["bl"][d])
    wlr_p = wlr_p.astype(bf16)

    w1_p = jnp.zeros((hpad, hpad), f32).at[:h_log, :h_log].set(params["W1"]).astype(bf16)
    b1_p = jnp.zeros((1, hpad), f32).at[0, :h_log].set(params["b1"])
    w2_p = jnp.zeros((hpad, outpad), f32).at[:h_log, :1].set(params["W2"]).astype(bf16)
    b2_p = jnp.zeros((1, outpad), f32).at[0, :1].set(params["b2"])

    packed = dict(We=we_p, be=be_p, Wlr=wlr_p, Bl=bl_p,
                  W1=w1_p, b1=b1_p, W2=w2_p, b2=b2_p)
    return x_p, adj_p, deg1h_p, pool_p, packed


# --------------------------------------------------------------------------
# main
# --------------------------------------------------------------------------
if __name__ == "__main__":
    n_node_features, n_hidden, num_conv_blocks = 8, 32, 2
    n_edge_features = 4
    n_per_graph, n_graphs = 8, 2
    n_nodes = n_per_graph * n_graphs

    key = jax.random.PRNGKey(0)
    k_x, k_e, k_p = jax.random.split(key, 3)

    x = jax.random.normal(k_x, (n_nodes, n_node_features), jnp.float32)
    batch_idx = jnp.repeat(jnp.arange(n_graphs, dtype=jnp.int32), n_per_graph)

    # bidirectional chain edges within each graph -> edge_index (2, E)
    src, tgt = [], []
    for g in range(n_graphs):
        base = g * n_per_graph
        for i in range(n_per_graph - 1):
            src += [base + i, base + i + 1]
            tgt += [base + i + 1, base + i]
    edge_index = jnp.array([src, tgt], dtype=jnp.int32)              # (2, 28)
    # edge_attr is part of the module signature but unused (no RGCNConv layers).
    edge_attr = jax.random.normal(k_e, (edge_index.shape[1], n_edge_features), jnp.float32)

    # densify graph structure (hoisted out of the kernel, shared by all layers):
    # adjacency adj[i, j] = 1 iff edge j -> i, clamped in-degree, pooling matrix.
    adj = jnp.zeros((n_nodes, n_nodes), jnp.float32).at[edge_index[1], edge_index[0]].set(1.0)
    deg = jnp.minimum(jnp.sum(adj, axis=1).astype(jnp.int32), MAX_DEGREE)
    pool = (batch_idx[None, :] == jnp.arange(n_graphs)[:, None]).astype(jnp.float32)

    params = init_params(k_p, n_node_features, n_hidden, num_conv_blocks)

    x_p, adj_p, deg1h_p, pool_p, packed = pack_inputs_and_params(x, adj, deg, pool, params)

    out = gnn_no_rel_forward(x_p, adj_p, deg1h_p, pool_p, packed, n_graphs)
    out = jax.block_until_ready(out)

    ref = reference_forward(x, adj, deg, pool, params)
    assert out.shape == (n_graphs, 1)
    # bf16 MXU operands vs f32 reference -> loosened tolerance
    assert jnp.allclose(out, ref, rtol=3e-2, atol=3e-2), (
        f"Pallas output mismatch vs JAX reference: {out} vs {ref}")

    print("KERNEL_OK")
</pallas_src>

<mosaic_0001>
module attributes {stable_mosaic.version = 11 : i64} {
  func.func @gnn_no_rel_kernel(%arg0: memref<16x16xbf16, #tpu.memory_space<vmem>>, %arg1: memref<16x16xbf16, #tpu.memory_space<vmem>>, %arg2: memref<16x16xbf16, #tpu.memory_space<vmem>>, %arg3: memref<16x16xbf16, #tpu.memory_space<vmem>>, %arg4: memref<16x128xbf16, #tpu.memory_space<vmem>>, %arg5: memref<1x128xf32, #tpu.memory_space<vmem>>, %arg6: memref<2x11x256x128xbf16, #tpu.memory_space<vmem>>, %arg7: memref<2x11x1x128xf32, #tpu.memory_space<vmem>>, %arg8: memref<128x128xbf16, #tpu.memory_space<vmem>>, %arg9: memref<1x128xf32, #tpu.memory_space<vmem>>, %arg10: memref<128x128xbf16, #tpu.memory_space<vmem>>, %arg11: memref<1x128xf32, #tpu.memory_space<vmem>>, %arg12: memref<16x128xf32, #tpu.memory_space<vmem>>) attributes {dimension_semantics = [], scalar_prefetch = 0 : i64, scratch_operands = 0 : i64, tpu.core_type = #tpu.core_type<tc>} {
    %c0 = arith.constant 0 : index
    %c0_0 = arith.constant 0 : index
    %0 = vector.load %arg0[%c0, %c0_0] : memref<16x16xbf16, #tpu.memory_space<vmem>>, vector<16x16xbf16>
    %c0_1 = arith.constant 0 : index
    %c0_2 = arith.constant 0 : index
    %1 = vector.load %arg4[%c0_1, %c0_2] : memref<16x128xbf16, #tpu.memory_space<vmem>>, vector<16x128xbf16>
    %cst = arith.constant dense<0.000000e+00> : vector<16x128xf32>
    %2 = tpu.matmul %0, %1, %cst {dimension_numbers = #tpu.dot_dimension_numbers<[1], [0], [0], [1], [0, 0, 1, 1], [], []>} : vector<16x16xbf16>, vector<16x128xbf16>, vector<16x128xf32> -> vector<16x128xf32>
    %c0_3 = arith.constant 0 : index
    %c0_4 = arith.constant 0 : index
    %3 = vector.load %arg5[%c0_3, %c0_4] : memref<1x128xf32, #tpu.memory_space<vmem>>, vector<1x128xf32>
    %4 = vector.broadcast %3 : vector<1x128xf32> to vector<16x128xf32>
    %5 = arith.addf %2, %4 : vector<16x128xf32>
    %c0_5 = arith.constant 0 : index
    %c0_6 = arith.constant 0 : index
    %6 = vector.load %arg1[%c0_5, %c0_6] : memref<16x16xbf16, #tpu.memory_space<vmem>>, vector<16x16xbf16>
    %c0_7 = arith.constant 0 : index
    %c0_8 = arith.constant 0 : index
    %7 = vector.load %arg2[%c0_7, %c0_8] : memref<16x16xbf16, #tpu.memory_space<vmem>>, vector<16x16xbf16>
    %8 = arith.extf %7 : vector<16x16xbf16> to vector<16x16xf32>
    %9 = arith.truncf %5 : vector<16x128xf32> to vector<16x128xbf16>
    %cst_9 = arith.constant dense<0.000000e+00> : vector<16x128xf32>
    %10 = tpu.matmul %6, %9, %cst_9 {dimension_numbers = #tpu.dot_dimension_numbers<[1], [0], [0], [1], [0, 0, 1, 1], [], []>} : vector<16x16xbf16>, vector<16x128xbf16>, vector<16x128xf32> -> vector<16x128xf32>
    %11 = tpu.concatenate %10, %5 in 1 : vector<16x128xf32>, vector<16x128xf32> -> vector<16x256xf32>
    %12 = arith.truncf %11 : vector<16x256xf32> to vector<16x256xbf16>
    %cst_10 = arith.constant 0.000000e+00 : f32
    %13 = vector.broadcast %cst_10 : f32 to vector<16x128xf32>
    %14 = vector.extract_strided_slice %8 {offsets = [0, 0], sizes = [16, 1], strides = [1, 1]} : vector<16x16xf32> to vector<16x1xf32>
    %c0_11 = arith.constant 0 : index
    %c0_12 = arith.constant 0 : index
    %c0_13 = arith.constant 0 : index
    %c0_14 = arith.constant 0 : index
    %15 = vector.load %arg6[%c0_11, %c0_12, %c0_13, %c0_14] : memref<2x11x256x128xbf16, #tpu.memory_space<vmem>>, vector<1x1x256x128xbf16>
    %16 = vector.shape_cast %15 : vector<1x1x256x128xbf16> to vector<256x128xbf16>
    %cst_15 = arith.constant dense<0.000000e+00> : vector<16x128xf32>
    %17 = tpu.matmul %12, %16, %cst_15 {dimension_numbers = #tpu.dot_dimension_numbers<[1], [0], [0], [1], [0, 0, 1, 1], [], []>} : vector<16x256xbf16>, vector<256x128xbf16>, vector<16x128xf32> -> vector<16x128xf32>
    %c0_16 = arith.constant 0 : index
    %c0_17 = arith.constant 0 : index
    %c0_18 = arith.constant 0 : index
    %c0_19 = arith.constant 0 : index
    %18 = vector.load %arg7[%c0_16, %c0_17, %c0_18, %c0_19] : memref<2x11x1x128xf32, #tpu.memory_space<vmem>>, vector<1x1x1x128xf32>
    %19 = vector.shape_cast %18 : vector<1x1x1x128xf32> to vector<1x128xf32>
    %20 = vector.broadcast %19 : vector<1x128xf32> to vector<16x128xf32>
    %21 = arith.addf %17, %20 : vector<16x128xf32>
    %22 = vector.broadcast %14 : vector<16x1xf32> to vector<16x128xf32>
    %23 = arith.mulf %22, %21 : vector<16x128xf32>
    %24 = arith.addf %13, %23 : vector<16x128xf32>
    %25 = vector.extract_strided_slice %8 {offsets = [0, 1], sizes = [16, 1], strides = [1, 1]} : vector<16x16xf32> to vector<16x1xf32>
    %c0_20 = arith.constant 0 : index
    %c1 = arith.constant 1 : index
    %c0_21 = arith.constant 0 : index
    %c0_22 = arith.constant 0 : index
    %26 = vector.load %arg6[%c0_20, %c1, %c0_21, %c0_22] : memref<2x11x256x128xbf16, #tpu.memory_space<vmem>>, vector<1x1x256x128xbf16>
    %27 = vector.shape_cast %26 : vector<1x1x256x128xbf16> to vector<256x128xbf16>
    %cst_23 = arith.constant dense<0.000000e+00> : vector<16x128xf32>
    %28 = tpu.matmul %12, %27, %cst_23 {dimension_numbers = #tpu.dot_dimension_numbers<[1], [0], [0], [1], [0, 0, 1, 1], [], []>} : vector<16x256xbf16>, vector<256x128xbf16>, vector<16x128xf32> -> vector<16x128xf32>
    %c0_24 = arith.constant 0 : index
    %c1_25 = arith.constant 1 : index
    %c0_26 = arith.constant 0 : index
    %c0_27 = arith.constant 0 : index
    %29 = vector.load %arg7[%c0_24, %c1_25, %c0_26, %c0_27] : memref<2x11x1x128xf32, #tpu.memory_space<vmem>>, vector<1x1x1x128xf32>
    %30 = vector.shape_cast %29 : vector<1x1x1x128xf32> to vector<1x128xf32>
    %31 = vector.broadcast %30 : vector<1x128xf32> to vector<16x128xf32>
    %32 = arith.addf %28, %31 : vector<16x128xf32>
    %33 = vector.broadcast %25 : vector<16x1xf32> to vector<16x128xf32>
    %34 = arith.mulf %33, %32 : vector<16x128xf32>
    %35 = arith.addf %24, %34 : vector<16x128xf32>
    %36 = vector.extract_strided_slice %8 {offsets = [0, 2], sizes = [16, 1], strides = [1, 1]} : vector<16x16xf32> to vector<16x1xf32>
    %c0_28 = arith.constant 0 : index
    %c2 = arith.constant 2 : index
    %c0_29 = arith.constant 0 : index
    %c0_30 = arith.constant 0 : index
    %37 = vector.load %arg6[%c0_28, %c2, %c0_29, %c0_30] : memref<2x11x256x128xbf16, #tpu.memory_space<vmem>>, vector<1x1x256x128xbf16>
    %38 = vector.shape_cast %37 : vector<1x1x256x128xbf16> to vector<256x128xbf16>
    %cst_31 = arith.constant dense<0.000000e+00> : vector<16x128xf32>
    %39 = tpu.matmul %12, %38, %cst_31 {dimension_numbers = #tpu.dot_dimension_numbers<[1], [0], [0], [1], [0, 0, 1, 1], [], []>} : vector<16x256xbf16>, vector<256x128xbf16>, vector<16x128xf32> -> vector<16x128xf32>
    %c0_32 = arith.constant 0 : index
    %c2_33 = arith.constant 2 : index
    %c0_34 = arith.constant 0 : index
    %c0_35 = arith.constant 0 : index
    %40 = vector.load %arg7[%c0_32, %c2_33, %c0_34, %c0_35] : memref<2x11x1x128xf32, #tpu.memory_space<vmem>>, vector<1x1x1x128xf32>
    %41 = vector.shape_cast %40 : vector<1x1x1x128xf32> to vector<1x128xf32>
    %42 = vector.broadcast %41 : vector<1x128xf32> to vector<16x128xf32>
    %43 = arith.addf %39, %42 : vector<16x128xf32>
    %44 = vector.broadcast %36 : vector<16x1xf32> to vector<16x128xf32>
    %45 = arith.mulf %44, %43 : vector<16x128xf32>
    %46 = arith.addf %35, %45 : vector<16x128xf32>
    %47 = vector.extract_strided_slice %8 {offsets = [0, 3], sizes = [16, 1], strides = [1, 1]} : vector<16x16xf32> to vector<16x1xf32>
    %c0_36 = arith.constant 0 : index
    %c3 = arith.constant 3 : index
    %c0_37 = arith.constant 0 : index
    %c0_38 = arith.constant 0 : index
    %48 = vector.load %arg6[%c0_36, %c3, %c0_37, %c0_38] : memref<2x11x256x128xbf16, #tpu.memory_space<vmem>>, vector<1x1x256x128xbf16>
    %49 = vector.shape_cast %48 : vector<1x1x256x128xbf16> to vector<256x128xbf16>
    %cst_39 = arith.constant dense<0.000000e+00> : vector<16x128xf32>
    %50 = tpu.matmul %12, %49, %cst_39 {dimension_numbers = #tpu.dot_dimension_numbers<[1], [0], [0], [1], [0, 0, 1, 1], [], []>} : vector<16x256xbf16>, vector<256x128xbf16>, vector<16x128xf32> -> vector<16x128xf32>
    %c0_40 = arith.constant 0 : index
    %c3_41 = arith.constant 3 : index
    %c0_42 = arith.constant 0 : index
    %c0_43 = arith.constant 0 : index
    %51 = vector.load %arg7[%c0_40, %c3_41, %c0_42, %c0_43] : memref<2x11x1x128xf32, #tpu.memory_space<vmem>>, vector<1x1x1x128xf32>
    %52 = vector.shape_cast %51 : vector<1x1x1x128xf32> to vector<1x128xf32>
    %53 = vector.broadcast %52 : vector<1x128xf32> to vector<16x128xf32>
    %54 = arith.addf %50, %53 : vector<16x128xf32>
    %55 = vector.broadcast %47 : vector<16x1xf32> to vector<16x128xf32>
    %56 = arith.mulf %55, %54 : vector<16x128xf32>
    %57 = arith.addf %46, %56 : vector<16x128xf32>
    %58 = vector.extract_strided_slice %8 {offsets = [0, 4], sizes = [16, 1], strides = [1, 1]} : vector<16x16xf32> to vector<16x1xf32>
    %c0_44 = arith.constant 0 : index
    %c4 = arith.constant 4 : index
    %c0_45 = arith.constant 0 : index
    %c0_46 = arith.constant 0 : index
    %59 = vector.load %arg6[%c0_44, %c4, %c0_45, %c0_46] : memref<2x11x256x128xbf16, #tpu.memory_space<vmem>>, vector<1x1x256x128xbf16>
    %60 = vector.shape_cast %59 : vector<1x1x256x128xbf16> to vector<256x128xbf16>
    %cst_47 = arith.constant dense<0.000000e+00> : vector<16x128xf32>
    %61 = tpu.matmul %12, %60, %cst_47 {dimension_numbers = #tpu.dot_dimension_numbers<[1], [0], [0], [1], [0, 0, 1, 1], [], []>} : vector<16x256xbf16>, vector<256x128xbf16>, vector<16x128xf32> -> vector<16x128xf32>
    %c0_48 = arith.constant 0 : index
    %c4_49 = arith.constant 4 : index
    %c0_50 = arith.constant 0 : index
    %c0_51 = arith.constant 0 : index
    %62 = vector.load %arg7[%c0_48, %c4_49, %c0_50, %c0_51] : memref<2x11x1x128xf32, #tpu.memory_space<vmem>>, vector<1x1x1x128xf32>
    %63 = vector.shape_cast %62 : vector<1x1x1x128xf32> to vector<1x128xf32>
    %64 = vector.broadcast %63 : vector<1x128xf32> to vector<16x128xf32>
    %65 = arith.addf %61, %64 : vector<16x128xf32>
    %66 = vector.broadcast %58 : vector<16x1xf32> to vector<16x128xf32>
    %67 = arith.mulf %66, %65 : vector<16x128xf32>
    %68 = arith.addf %57, %67 : vector<16x128xf32>
    %69 = vector.extract_strided_slice %8 {offsets = [0, 5], sizes = [16, 1], strides = [1, 1]} : vector<16x16xf32> to vector<16x1xf32>
    %c0_52 = arith.constant 0 : index
    %c5 = arith.constant 5 : index
    %c0_53 = arith.constant 0 : index
    %c0_54 = arith.constant 0 : index
    %70 = vector.load %arg6[%c0_52, %c5, %c0_53, %c0_54] : memref<2x11x256x128xbf16, #tpu.memory_space<vmem>>, vector<1x1x256x128xbf16>
    %71 = vector.shape_cast %70 : vector<1x1x256x128xbf16> to vector<256x128xbf16>
    %cst_55 = arith.constant dense<0.000000e+00> : vector<16x128xf32>
    %72 = tpu.matmul %12, %71, %cst_55 {dimension_numbers = #tpu.dot_dimension_numbers<[1], [0], [0], [1], [0, 0, 1, 1], [], []>} : vector<16x256xbf16>, vector<256x128xbf16>, vector<16x128xf32> -> vector<16x128xf32>
    %c0_56 = arith.constant 0 : index
    %c5_57 = arith.constant 5 : index
    %c0_58 = arith.constant 0 : index
    %c0_59 = arith.constant 0 : index
    %73 = vector.load %arg7[%c0_56, %c5_57, %c0_58, %c0_59] : memref<2x11x1x128xf32, #tpu.memory_space<vmem>>, vector<1x1x1x128xf32>
    %74 = vector.shape_cast %73 : vector<1x1x1x128xf32> to vector<1x128xf32>
    %75 = vector.broadcast %74 : vector<1x128xf32> to vector<16x128xf32>
    %76 = arith.addf %72, %75 : vector<16x128xf32>
    %77 = vector.broadcast %69 : vector<16x1xf32> to vector<16x128xf32>
    %78 = arith.mulf %77, %76 : vector<16x128xf32>
    %79 = arith.addf %68, %78 : vector<16x128xf32>
    %80 = vector.extract_strided_slice %8 {offsets = [0, 6], sizes = [16, 1], strides = [1, 1]} : vector<16x16xf32> to vector<16x1xf32>
    %c0_60 = arith.constant 0 : index
    %c6 = arith.constant 6 : index
    %c0_61 = arith.constant 0 : index
    %c0_62 = arith.constant 0 : index
    %81 = vector.load %arg6[%c0_60, %c6, %c0_61, %c0_62] : memref<2x11x256x128xbf16, #tpu.memory_space<vmem>>, vector<1x1x256x128xbf16>
    %82 = vector.shape_cast %81 : vector<1x1x256x128xbf16> to vector<256x128xbf16>
    %cst_63 = arith.constant dense<0.000000e+00> : vector<16x128xf32>
    %83 = tpu.matmul %12, %82, %cst_63 {dimension_numbers = #tpu.dot_dimension_numbers<[1], [0], [0], [1], [0, 0, 1, 1], [], []>} : vector<16x256xbf16>, vector<256x128xbf16>, vector<16x128xf32> -> vector<16x128xf32>
    %c0_64 = arith.constant 0 : index
    %c6_65 = arith.constant 6 : index
    %c0_66 = arith.constant 0 : index
    %c0_67 = arith.constant 0 : index
    %84 = vector.load %arg7[%c0_64, %c6_65, %c0_66, %c0_67] : memref<2x11x1x128xf32, #tpu.memory_space<vmem>>, vector<1x1x1x128xf32>
    %85 = vector.shape_cast %84 : vector<1x1x1x128xf32> to vector<1x128xf32>
    %86 = vector.broadcast %85 : vector<1x128xf32> to vector<16x128xf32>
    %87 = arith.addf %83, %86 : vector<16x128xf32>
    %88 = vector.broadcast %80 : vector<16x1xf32> to vector<16x128xf32>
    %89 = arith.mulf %88, %87 : vector<16x128xf32>
    %90 = arith.addf %79, %89 : vector<16x128xf32>
    %91 = vector.extract_strided_slice %8 {offsets = [0, 7], sizes = [16, 1], strides = [1, 1]} : vector<16x16xf32> to vector<16x1xf32>
    %c0_68 = arith.constant 0 : index
    %c7 = arith.constant 7 : index
    %c0_69 = arith.constant 0 : index
    %c0_70 = arith.constant 0 : index
    %92 = vector.load %arg6[%c0_68, %c7, %c0_69, %c0_70] : memref<2x11x256x128xbf16, #tpu.memory_space<vmem>>, vector<1x1x256x128xbf16>
    %93 = vector.shape_cast %92 : vector<1x1x256x128xbf16> to vector<256x128xbf16>
    %cst_71 = arith.constant dense<0.000000e+00> : vector<16x128xf32>
    %94 = tpu.matmul %12, %93, %cst_71 {dimension_numbers = #tpu.dot_dimension_numbers<[1], [0], [0], [1], [0, 0, 1, 1], [], []>} : vector<16x256xbf16>, vector<256x128xbf16>, vector<16x128xf32> -> vector<16x128xf32>
    %c0_72 = arith.constant 0 : index
    %c7_73 = arith.constant 7 : index
    %c0_74 = arith.constant 0 : index
    %c0_75 = arith.constant 0 : index
    %95 = vector.load %arg7[%c0_72, %c7_73, %c0_74, %c0_75] : memref<2x11x1x128xf32, #tpu.memory_space<vmem>>, vector<1x1x1x128xf32>
    %96 = vector.shape_cast %95 : vector<1x1x1x128xf32> to vector<1x128xf32>
    %97 = vector.broadcast %96 : vector<1x128xf32> to vector<16x128xf32>
    %98 = arith.addf %94, %97 : vector<16x128xf32>
    %99 = vector.broadcast %91 : vector<16x1xf32> to vector<16x128xf32>
    %100 = arith.mulf %99, %98 : vector<16x128xf32>
    %101 = arith.addf %90, %100 : vector<16x128xf32>
    %102 = vector.extract_strided_slice %8 {offsets = [0, 8], sizes = [16, 1], strides = [1, 1]} : vector<16x16xf32> to vector<16x1xf32>
    %c0_76 = arith.constant 0 : index
    %c8 = arith.constant 8 : index
    %c0_77 = arith.constant 0 : index
    %c0_78 = arith.constant 0 : index
    %103 = vector.load %arg6[%c0_76, %c8, %c0_77, %c0_78] : memref<2x11x256x128xbf16, #tpu.memory_space<vmem>>, vector<1x1x256x128xbf16>
    %104 = vector.shape_cast %103 : vector<1x1x256x128xbf16> to vector<256x128xbf16>
    %cst_79 = arith.constant dense<0.000000e+00> : vector<16x128xf32>
    %105 = tpu.matmul %12, %104, %cst_79 {dimension_numbers = #tpu.dot_dimension_numbers<[1], [0], [0], [1], [0, 0, 1, 1], [], []>} : vector<16x256xbf16>, vector<256x128xbf16>, vector<16x128xf32> -> vector<16x128xf32>
    %c0_80 = arith.constant 0 : index
    %c8_81 = arith.constant 8 : index
    %c0_82 = arith.constant 0 : index
    %c0_83 = arith.constant 0 : index
    %106 = vector.load %arg7[%c0_80, %c8_81, %c0_82, %c0_83] : memref<2x11x1x128xf32, #tpu.memory_space<vmem>>, vector<1x1x1x128xf32>
    %107 = vector.shape_cast %106 : vector<1x1x1x128xf32> to vector<1x128xf32>
    %108 = vector.broadcast %107 : vector<1x128xf32> to vector<16x128xf32>
    %109 = arith.addf %105, %108 : vector<16x128xf32>
    %110 = vector.broadcast %102 : vector<16x1xf32> to vector<16x128xf32>
    %111 = arith.mulf %110, %109 : vector<16x128xf32>
    %112 = arith.addf %101, %111 : vector<16x128xf32>
    %113 = vector.extract_strided_slice %8 {offsets = [0, 9], sizes = [16, 1], strides = [1, 1]} : vector<16x16xf32> to vector<16x1xf32>
    %c0_84 = arith.constant 0 : index
    %c9 = arith.constant 9 : index
    %c0_85 = arith.constant 0 : index
    %c0_86 = arith.constant 0 : index
    %114 = vector.load %arg6[%c0_84, %c9, %c0_85, %c0_86] : memref<2x11x256x128xbf16, #tpu.memory_space<vmem>>, vector<1x1x256x128xbf16>
    %115 = vector.shape_cast %114 : vector<1x1x256x128xbf16> to vector<256x128xbf16>
    %cst_87 = arith.constant dense<0.000000e+00> : vector<16x128xf32>
    %116 = tpu.matmul %12, %115, %cst_87 {dimension_numbers = #tpu.dot_dimension_numbers<[1], [0], [0], [1], [0, 0, 1, 1], [], []>} : vector<16x256xbf16>, vector<256x128xbf16>, vector<16x128xf32> -> vector<16x128xf32>
    %c0_88 = arith.constant 0 : index
    %c9_89 = arith.constant 9 : index
    %c0_90 = arith.constant 0 : index
    %c0_91 = arith.constant 0 : index
    %117 = vector.load %arg7[%c0_88, %c9_89, %c0_90, %c0_91] : memref<2x11x1x128xf32, #tpu.memory_space<vmem>>, vector<1x1x1x128xf32>
    %118 = vector.shape_cast %117 : vector<1x1x1x128xf32> to vector<1x128xf32>
    %119 = vector.broadcast %118 : vector<1x128xf32> to vector<16x128xf32>
    %120 = arith.addf %116, %119 : vector<16x128xf32>
    %121 = vector.broadcast %113 : vector<16x1xf32> to vector<16x128xf32>
    %122 = arith.mulf %121, %120 : vector<16x128xf32>
    %123 = arith.addf %112, %122 : vector<16x128xf32>
    %124 = vector.extract_strided_slice %8 {offsets = [0, 10], sizes = [16, 1], strides = [1, 1]} : vector<16x16xf32> to vector<16x1xf32>
    %c0_92 = arith.constant 0 : index
    %c10 = arith.constant 10 : index
    %c0_93 = arith.constant 0 : index
    %c0_94 = arith.constant 0 : index
    %125 = vector.load %arg6[%c0_92, %c10, %c0_93, %c0_94] : memref<2x11x256x128xbf16, #tpu.memory_space<vmem>>, vector<1x1x256x128xbf16>
    %126 = vector.shape_cast %125 : vector<1x1x256x128xbf16> to vector<256x128xbf16>
    %cst_95 = arith.constant dense<0.000000e+00> : vector<16x128xf32>
    %127 = tpu.matmul %12, %126, %cst_95 {dimension_numbers = #tpu.dot_dimension_numbers<[1], [0], [0], [1], [0, 0, 1, 1], [], []>} : vector<16x256xbf16>, vector<256x128xbf16>, vector<16x128xf32> -> vector<16x128xf32>
    %c0_96 = arith.constant 0 : index
    %c10_97 = arith.constant 10 : index
    %c0_98 = arith.constant 0 : index
    %c0_99 = arith.constant 0 : index
    %128 = vector.load %arg7[%c0_96, %c10_97, %c0_98, %c0_99] : memref<2x11x1x128xf32, #tpu.memory_space<vmem>>, vector<1x1x1x128xf32>
    %129 = vector.shape_cast %128 : vector<1x1x1x128xf32> to vector<1x128xf32>
    %130 = vector.broadcast %129 : vector<1x128xf32> to vector<16x128xf32>
    %131 = arith.addf %127, %130 : vector<16x128xf32>
    %132 = vector.broadcast %124 : vector<16x1xf32> to vector<16x128xf32>
    %133 = arith.mulf %132, %131 : vector<16x128xf32>
    %134 = arith.addf %123, %133 : vector<16x128xf32>
    %cst_100 = arith.constant 0.000000e+00 : f32
    %135 = vector.broadcast %cst_100 : f32 to vector<16x128xf32>
    %136 = arith.maximumf %134, %135 : vector<16x128xf32>
    %137 = arith.truncf %136 : vector<16x128xf32> to vector<16x128xbf16>
    %cst_101 = arith.constant dense<0.000000e+00> : vector<16x128xf32>
    %138 = tpu.matmul %6, %137, %cst_101 {dimension_numbers = #tpu.dot_dimension_numbers<[1], [0], [0], [1], [0, 0, 1, 1], [], []>} : vector<16x16xbf16>, vector<16x128xbf16>, vector<16x128xf32> -> vector<16x128xf32>
    %139 = tpu.concatenate %138, %136 in 1 : vector<16x128xf32>, vector<16x128xf32> -> vector<16x256xf32>
    %140 = arith.truncf %139 : vector<16x256xf32> to vector<16x256xbf16>
    %cst_102 = arith.constant 0.000000e+00 : f32
    %141 = vector.broadcast %cst_102 : f32 to vector<16x128xf32>
    %142 = vector.extract_strided_slice %8 {offsets = [0, 0], sizes = [16, 1], strides = [1, 1]} : vector<16x16xf32> to vector<16x1xf32>
    %c1_103 = arith.constant 1 : index
    %c0_104 = arith.constant 0 : index
    %c0_105 = arith.constant 0 : index
    %c0_106 = arith.constant 0 : index
    %143 = vector.load %arg6[%c1_103, %c0_104, %c0_105, %c0_106] : memref<2x11x256x128xbf16, #tpu.memory_space<vmem>>, vector<1x1x256x128xbf16>
    %144 = vector.shape_cast %143 : vector<1x1x256x128xbf16> to vector<256x128xbf16>
    %cst_107 = arith.constant dense<0.000000e+00> : vector<16x128xf32>
    %145 = tpu.matmul %140, %144, %cst_107 {dimension_numbers = #tpu.dot_dimension_numbers<[1], [0], [0], [1], [0, 0, 1, 1], [], []>} : vector<16x256xbf16>, vector<256x128xbf16>, vector<16x128xf32> -> vector<16x128xf32>
    %c1_108 = arith.constant 1 : index
    %c0_109 = arith.constant 0 : index
    %c0_110 = arith.constant 0 : index
    %c0_111 = arith.constant 0 : index
    %146 = vector.load %arg7[%c1_108, %c0_109, %c0_110, %c0_111] : memref<2x11x1x128xf32, #tpu.memory_space<vmem>>, vector<1x1x1x128xf32>
    %147 = vector.shape_cast %146 : vector<1x1x1x128xf32> to vector<1x128xf32>
    %148 = vector.broadcast %147 : vector<1x128xf32> to vector<16x128xf32>
    %149 = arith.addf %145, %148 : vector<16x128xf32>
    %150 = vector.broadcast %142 : vector<16x1xf32> to vector<16x128xf32>
    %151 = arith.mulf %150, %149 : vector<16x128xf32>
    %152 = arith.addf %141, %151 : vector<16x128xf32>
    %153 = vector.extract_strided_slice %8 {offsets = [0, 1], sizes = [16, 1], strides = [1, 1]} : vector<16x16xf32> to vector<16x1xf32>
    %c1_112 = arith.constant 1 : index
    %c1_113 = arith.constant 1 : index
    %c0_114 = arith.constant 0 : index
    %c0_115 = arith.constant 0 : index
    %154 = vector.load %arg6[%c1_112, %c1_113, %c0_114, %c0_115] : memref<2x11x256x128xbf16, #tpu.memory_space<vmem>>, vector<1x1x256x128xbf16>
    %155 = vector.shape_cast %154 : vector<1x1x256x128xbf16> to vector<256x128xbf16>
    %cst_116 = arith.constant dense<0.000000e+00> : vector<16x128xf32>
    %156 = tpu.matmul %140, %155, %cst_116 {dimension_numbers = #tpu.dot_dimension_numbers<[1], [0], [0], [1], [0, 0, 1, 1], [], []>} : vector<16x256xbf16>, vector<256x128xbf16>, vector<16x128xf32> -> vector<16x128xf32>
    %c1_117 = arith.constant 1 : index
    %c1_118 = arith.constant 1 : index
    %c0_119 = arith.constant 0 : index
    %c0_120 = arith.constant 0 : index
    %157 = vector.load %arg7[%c1_117, %c1_118, %c0_119, %c0_120] : memref<2x11x1x128xf32, #tpu.memory_space<vmem>>, vector<1x1x1x128xf32>
    %158 = vector.shape_cast %157 : vector<1x1x1x128xf32> to vector<1x128xf32>
    %159 = vector.broadcast %158 : vector<1x128xf32> to vector<16x128xf32>
    %160 = arith.addf %156, %159 : vector<16x128xf32>
    %161 = vector.broadcast %153 : vector<16x1xf32> to vector<16x128xf32>
    %162 = arith.mulf %161, %160 : vector<16x128xf32>
    %163 = arith.addf %152, %162 : vector<16x128xf32>
    %164 = vector.extract_strided_slice %8 {offsets = [0, 2], sizes = [16, 1], strides = [1, 1]} : vector<16x16xf32> to vector<16x1xf32>
    %c1_121 = arith.constant 1 : index
    %c2_122 = arith.constant 2 : index
    %c0_123 = arith.constant 0 : index
    %c0_124 = arith.constant 0 : index
    %165 = vector.load %arg6[%c1_121, %c2_122, %c0_123, %c0_124] : memref<2x11x256x128xbf16, #tpu.memory_space<vmem>>, vector<1x1x256x128xbf16>
    %166 = vector.shape_cast %165 : vector<1x1x256x128xbf16> to vector<256x128xbf16>
    %cst_125 = arith.constant dense<0.000000e+00> : vector<16x128xf32>
    %167 = tpu.matmul %140, %166, %cst_125 {dimension_numbers = #tpu.dot_dimension_numbers<[1], [0], [0], [1], [0, 0, 1, 1], [], []>} : vector<16x256xbf16>, vector<256x128xbf16>, vector<16x128xf32> -> vector<16x128xf32>
    %c1_126 = arith.constant 1 : index
    %c2_127 = arith.constant 2 : index
    %c0_128 = arith.constant 0 : index
    %c0_129 = arith.constant 0 : index
    %168 = vector.load %arg7[%c1_126, %c2_127, %c0_128, %c0_129] : memref<2x11x1x128xf32, #tpu.memory_space<vmem>>, vector<1x1x1x128xf32>
    %169 = vector.shape_cast %168 : vector<1x1x1x128xf32> to vector<1x128xf32>
    %170 = vector.broadcast %169 : vector<1x128xf32> to vector<16x128xf32>
    %171 = arith.addf %167, %170 : vector<16x128xf32>
    %172 = vector.broadcast %164 : vector<16x1xf32> to vector<16x128xf32>
    %173 = arith.mulf %172, %171 : vector<16x128xf32>
    %174 = arith.addf %163, %173 : vector<16x128xf32>
    %175 = vector.extract_strided_slice %8 {offsets = [0, 3], sizes = [16, 1], strides = [1, 1]} : vector<16x16xf32> to vector<16x1xf32>
    %c1_130 = arith.constant 1 : index
    %c3_131 = arith.constant 3 : index
    %c0_132 = arith.constant 0 : index
    %c0_133 = arith.constant 0 : index
    %176 = vector.load %arg6[%c1_130, %c3_131, %c0_132, %c0_133] : memref<2x11x256x128xbf16, #tpu.memory_space<vmem>>, vector<1x1x256x128xbf16>
    %177 = vector.shape_cast %176 : vector<1x1x256x128xbf16> to vector<256x128xbf16>
    %cst_134 = arith.constant dense<0.000000e+00> : vector<16x128xf32>
    %178 = tpu.matmul %140, %177, %cst_134 {dimension_numbers = #tpu.dot_dimension_numbers<[1], [0], [0], [1], [0, 0, 1, 1], [], []>} : vector<16x256xbf16>, vector<256x128xbf16>, vector<16x128xf32> -> vector<16x128xf32>
    %c1_135 = arith.constant 1 : index
    %c3_136 = arith.constant 3 : index
    %c0_137 = arith.constant 0 : index
    %c0_138 = arith.constant 0 : index
    %179 = vector.load %arg7[%c1_135, %c3_136, %c0_137, %c0_138] : memref<2x11x1x128xf32, #tpu.memory_space<vmem>>, vector<1x1x1x128xf32>
    %180 = vector.shape_cast %179 : vector<1x1x1x128xf32> to vector<1x128xf32>
    %181 = vector.broadcast %180 : vector<1x128xf32> to vector<16x128xf32>
    %182 = arith.addf %178, %181 : vector<16x128xf32>
    %183 = vector.broadcast %175 : vector<16x1xf32> to vector<16x128xf32>
    %184 = arith.mulf %183, %182 : vector<16x128xf32>
    %185 = arith.addf %174, %184 : vector<16x128xf32>
    %186 = vector.extract_strided_slice %8 {offsets = [0, 4], sizes = [16, 1], strides = [1, 1]} : vector<16x16xf32> to vector<16x1xf32>
    %c1_139 = arith.constant 1 : index
    %c4_140 = arith.constant 4 : index
    %c0_141 = arith.constant 0 : index
    %c0_142 = arith.constant 0 : index
    %187 = vector.load %arg6[%c1_139, %c4_140, %c0_141, %c0_142] : memref<2x11x256x128xbf16, #tpu.memory_space<vmem>>, vector<1x1x256x128xbf16>
    %188 = vector.shape_cast %187 : vector<1x1x256x128xbf16> to vector<256x128xbf16>
    %cst_143 = arith.constant dense<0.000000e+00> : vector<16x128xf32>
    %189 = tpu.matmul %140, %188, %cst_143 {dimension_numbers = #tpu.dot_dimension_numbers<[1], [0], [0], [1], [0, 0, 1, 1], [], []>} : vector<16x256xbf16>, vector<256x128xbf16>, vector<16x128xf32> -> vector<16x128xf32>
    %c1_144 = arith.constant 1 : index
    %c4_145 = arith.constant 4 : index
    %c0_146 = arith.constant 0 : index
    %c0_147 = arith.constant 0 : index
    %190 = vector.load %arg7[%c1_144, %c4_145, %c0_146, %c0_147] : memref<2x11x1x128xf32, #tpu.memory_space<vmem>>, vector<1x1x1x128xf32>
    %191 = vector.shape_cast %190 : vector<1x1x1x128xf32> to vector<1x128xf32>
    %192 = vector.broadcast %191 : vector<1x128xf32> to vector<16x128xf32>
    %193 = arith.addf %189, %192 : vector<16x128xf32>
    %194 = vector.broadcast %186 : vector<16x1xf32> to vector<16x128xf32>
    %195 = arith.mulf %194, %193 : vector<16x128xf32>
    %196 = arith.addf %185, %195 : vector<16x128xf32>
    %197 = vector.extract_strided_slice %8 {offsets = [0, 5], sizes = [16, 1], strides = [1, 1]} : vector<16x16xf32> to vector<16x1xf32>
    %c1_148 = arith.constant 1 : index
    %c5_149 = arith.constant 5 : index
    %c0_150 = arith.constant 0 : index
    %c0_151 = arith.constant 0 : index
    %198 = vector.load %arg6[%c1_148, %c5_149, %c0_150, %c0_151] : memref<2x11x256x128xbf16, #tpu.memory_space<vmem>>, vector<1x1x256x128xbf16>
    %199 = vector.shape_cast %198 : vector<1x1x256x128xbf16> to vector<256x128xbf16>
    %cst_152 = arith.constant dense<0.000000e+00> : vector<16x128xf32>
    %200 = tpu.matmul %140, %199, %cst_152 {dimension_numbers = #tpu.dot_dimension_numbers<[1], [0], [0], [1], [0, 0, 1, 1], [], []>} : vector<16x256xbf16>, vector<256x128xbf16>, vector<16x128xf32> -> vector<16x128xf32>
    %c1_153 = arith.constant 1 : index
    %c5_154 = arith.constant 5 : index
    %c0_155 = arith.constant 0 : index
    %c0_156 = arith.constant 0 : index
    %201 = vector.load %arg7[%c1_153, %c5_154, %c0_155, %c0_156] : memref<2x11x1x128xf32, #tpu.memory_space<vmem>>, vector<1x1x1x128xf32>
    %202 = vector.shape_cast %201 : vector<1x1x1x128xf32> to vector<1x128xf32>
    %203 = vector.broadcast %202 : vector<1x128xf32> to vector<16x128xf32>
    %204 = arith.addf %200, %203 : vector<16x128xf32>
    %205 = vector.broadcast %197 : vector<16x1xf32> to vector<16x128xf32>
    %206 = arith.mulf %205, %204 : vector<16x128xf32>
    %207 = arith.addf %196, %206 : vector<16x128xf32>
    %208 = vector.extract_strided_slice %8 {offsets = [0, 6], sizes = [16, 1], strides = [1, 1]} : vector<16x16xf32> to vector<16x1xf32>
    %c1_157 = arith.constant 1 : index
    %c6_158 = arith.constant 6 : index
    %c0_159 = arith.constant 0 : index
    %c0_160 = arith.constant 0 : index
    %209 = vector.load %arg6[%c1_157, %c6_158, %c0_159, %c0_160] : memref<2x11x256x128xbf16, #tpu.memory_space<vmem>>, vector<1x1x256x128xbf16>
    %210 = vector.shape_cast %209 : vector<1x1x256x128xbf16> to vector<256x128xbf16>
    %cst_161 = arith.constant dense<0.000000e+00> : vector<16x128xf32>
    %211 = tpu.matmul %140, %210, %cst_161 {dimension_numbers = #tpu.dot_dimension_numbers<[1], [0], [0], [1], [0, 0, 1, 1], [], []>} : vector<16x256xbf16>, vector<256x128xbf16>, vector<16x128xf32> -> vector<16x128xf32>
    %c1_162 = arith.constant 1 : index
    %c6_163 = arith.constant 6 : index
    %c0_164 = arith.constant 0 : index
    %c0_165 = arith.constant 0 : index
    %212 = vector.load %arg7[%c1_162, %c6_163, %c0_164, %c0_165] : memref<2x11x1x128xf32, #tpu.memory_space<vmem>>, vector<1x1x1x128xf32>
    %213 = vector.shape_cast %212 : vector<1x1x1x128xf32> to vector<1x128xf32>
    %214 = vector.broadcast %213 : vector<1x128xf32> to vector<16x128xf32>
    %215 = arith.addf %211, %214 : vector<16x128xf32>
    %216 = vector.broadcast %208 : vector<16x1xf32> to vector<16x128xf32>
    %217 = arith.mulf %216, %215 : vector<16x128xf32>
    %218 = arith.addf %207, %217 : vector<16x128xf32>
    %219 = vector.extract_strided_slice %8 {offsets = [0, 7], sizes = [16, 1], strides = [1, 1]} : vector<16x16xf32> to vector<16x1xf32>
    %c1_166 = arith.constant 1 : index
    %c7_167 = arith.constant 7 : index
    %c0_168 = arith.constant 0 : index
    %c0_169 = arith.constant 0 : index
    %220 = vector.load %arg6[%c1_166, %c7_167, %c0_168, %c0_169] : memref<2x11x256x128xbf16, #tpu.memory_space<vmem>>, vector<1x1x256x128xbf16>
    %221 = vector.shape_cast %220 : vector<1x1x256x128xbf16> to vector<256x128xbf16>
    %cst_170 = arith.constant dense<0.000000e+00> : vector<16x128xf32>
    %222 = tpu.matmul %140, %221, %cst_170 {dimension_numbers = #tpu.dot_dimension_numbers<[1], [0], [0], [1], [0, 0, 1, 1], [], []>} : vector<16x256xbf16>, vector<256x128xbf16>, vector<16x128xf32> -> vector<16x128xf32>
    %c1_171 = arith.constant 1 : index
    %c7_172 = arith.constant 7 : index
    %c0_173 = arith.constant 0 : index
    %c0_174 = arith.constant 0 : index
    %223 = vector.load %arg7[%c1_171, %c7_172, %c0_173, %c0_174] : memref<2x11x1x128xf32, #tpu.memory_space<vmem>>, vector<1x1x1x128xf32>
    %224 = vector.shape_cast %223 : vector<1x1x1x128xf32> to vector<1x128xf32>
    %225 = vector.broadcast %224 : vector<1x128xf32> to vector<16x128xf32>
    %226 = arith.addf %222, %225 : vector<16x128xf32>
    %227 = vector.broadcast %219 : vector<16x1xf32> to vector<16x128xf32>
    %228 = arith.mulf %227, %226 : vector<16x128xf32>
    %229 = arith.addf %218, %228 : vector<16x128xf32>
    %230 = vector.extract_strided_slice %8 {offsets = [0, 8], sizes = [16, 1], strides = [1, 1]} : vector<16x16xf32> to vector<16x1xf32>
    %c1_175 = arith.constant 1 : index
    %c8_176 = arith.constant 8 : index
    %c0_177 = arith.constant 0 : index
    %c0_178 = arith.constant 0 : index
    %231 = vector.load %arg6[%c1_175, %c8_176, %c0_177, %c0_178] : memref<2x11x256x128xbf16, #tpu.memory_space<vmem>>, vector<1x1x256x128xbf16>
    %232 = vector.shape_cast %231 : vector<1x1x256x128xbf16> to vector<256x128xbf16>
    %cst_179 = arith.constant dense<0.000000e+00> : vector<16x128xf32>
    %233 = tpu.matmul %140, %232, %cst_179 {dimension_numbers = #tpu.dot_dimension_numbers<[1], [0], [0], [1], [0, 0, 1, 1], [], []>} : vector<16x256xbf16>, vector<256x128xbf16>, vector<16x128xf32> -> vector<16x128xf32>
    %c1_180 = arith.constant 1 : index
    %c8_181 = arith.constant 8 : index
    %c0_182 = arith.constant 0 : index
    %c0_183 = arith.constant 0 : index
    %234 = vector.load %arg7[%c1_180, %c8_181, %c0_182, %c0_183] : memref<2x11x1x128xf32, #tpu.memory_space<vmem>>, vector<1x1x1x128xf32>
    %235 = vector.shape_cast %234 : vector<1x1x1x128xf32> to vector<1x128xf32>
    %236 = vector.broadcast %235 : vector<1x128xf32> to vector<16x128xf32>
    %237 = arith.addf %233, %236 : vector<16x128xf32>
    %238 = vector.broadcast %230 : vector<16x1xf32> to vector<16x128xf32>
    %239 = arith.mulf %238, %237 : vector<16x128xf32>
    %240 = arith.addf %229, %239 : vector<16x128xf32>
    %241 = vector.extract_strided_slice %8 {offsets = [0, 9], sizes = [16, 1], strides = [1, 1]} : vector<16x16xf32> to vector<16x1xf32>
    %c1_184 = arith.constant 1 : index
    %c9_185 = arith.constant 9 : index
    %c0_186 = arith.constant 0 : index
    %c0_187 = arith.constant 0 : index
    %242 = vector.load %arg6[%c1_184, %c9_185, %c0_186, %c0_187] : memref<2x11x256x128xbf16, #tpu.memory_space<vmem>>, vector<1x1x256x128xbf16>
    %243 = vector.shape_cast %242 : vector<1x1x256x128xbf16> to vector<256x128xbf16>
    %cst_188 = arith.constant dense<0.000000e+00> : vector<16x128xf32>
    %244 = tpu.matmul %140, %243, %cst_188 {dimension_numbers = #tpu.dot_dimension_numbers<[1], [0], [0], [1], [0, 0, 1, 1], [], []>} : vector<16x256xbf16>, vector<256x128xbf16>, vector<16x128xf32> -> vector<16x128xf32>
    %c1_189 = arith.constant 1 : index
    %c9_190 = arith.constant 9 : index
    %c0_191 = arith.constant 0 : index
    %c0_192 = arith.constant 0 : index
    %245 = vector.load %arg7[%c1_189, %c9_190, %c0_191, %c0_192] : memref<2x11x1x128xf32, #tpu.memory_space<vmem>>, vector<1x1x1x128xf32>
    %246 = vector.shape_cast %245 : vector<1x1x1x128xf32> to vector<1x128xf32>
    %247 = vector.broadcast %246 : vector<1x128xf32> to vector<16x128xf32>
    %248 = arith.addf %244, %247 : vector<16x128xf32>
    %249 = vector.broadcast %241 : vector<16x1xf32> to vector<16x128xf32>
    %250 = arith.mulf %249, %248 : vector<16x128xf32>
    %251 = arith.addf %240, %250 : vector<16x128xf32>
    %252 = vector.extract_strided_slice %8 {offsets = [0, 10], sizes = [16, 1], strides = [1, 1]} : vector<16x16xf32> to vector<16x1xf32>
    %c1_193 = arith.constant 1 : index
    %c10_194 = arith.constant 10 : index
    %c0_195 = arith.constant 0 : index
    %c0_196 = arith.constant 0 : index
    %253 = vector.load %arg6[%c1_193, %c10_194, %c0_195, %c0_196] : memref<2x11x256x128xbf16, #tpu.memory_space<vmem>>, vector<1x1x256x128xbf16>
    %254 = vector.shape_cast %253 : vector<1x1x256x128xbf16> to vector<256x128xbf16>
    %cst_197 = arith.constant dense<0.000000e+00> : vector<16x128xf32>
    %255 = tpu.matmul %140, %254, %cst_197 {dimension_numbers = #tpu.dot_dimension_numbers<[1], [0], [0], [1], [0, 0, 1, 1], [], []>} : vector<16x256xbf16>, vector<256x128xbf16>, vector<16x128xf32> -> vector<16x128xf32>
    %c1_198 = arith.constant 1 : index
    %c10_199 = arith.constant 10 : index
    %c0_200 = arith.constant 0 : index
    %c0_201 = arith.constant 0 : index
    %256 = vector.load %arg7[%c1_198, %c10_199, %c0_200, %c0_201] : memref<2x11x1x128xf32, #tpu.memory_space<vmem>>, vector<1x1x1x128xf32>
    %257 = vector.shape_cast %256 : vector<1x1x1x128xf32> to vector<1x128xf32>
    %258 = vector.broadcast %257 : vector<1x128xf32> to vector<16x128xf32>
    %259 = arith.addf %255, %258 : vector<16x128xf32>
    %260 = vector.broadcast %252 : vector<16x1xf32> to vector<16x128xf32>
    %261 = arith.mulf %260, %259 : vector<16x128xf32>
    %262 = arith.addf %251, %261 : vector<16x128xf32>
    %c0_202 = arith.constant 0 : index
    %c0_203 = arith.constant 0 : index
    %263 = vector.load %arg3[%c0_202, %c0_203] : memref<16x16xbf16, #tpu.memory_space<vmem>>, vector<16x16xbf16>
    %264 = arith.truncf %262 : vector<16x128xf32> to vector<16x128xbf16>
    %cst_204 = arith.constant dense<0.000000e+00> : vector<16x128xf32>
    %265 = tpu.matmul %263, %264, %cst_204 {dimension_numbers = #tpu.dot_dimension_numbers<[1], [0], [0], [1], [0, 0, 1, 1], [], []>} : vector<16x16xbf16>, vector<16x128xbf16>, vector<16x128xf32> -> vector<16x128xf32>
    %266 = arith.truncf %265 : vector<16x128xf32> to vector<16x128xbf16>
    %c0_205 = arith.constant 0 : index
    %c0_206 = arith.constant 0 : index
    %267 = vector.load %arg8[%c0_205, %c0_206] : memref<128x128xbf16, #tpu.memory_space<vmem>>, vector<128x128xbf16>
    %cst_207 = arith.constant dense<0.000000e+00> : vector<16x128xf32>
    %268 = tpu.matmul %266, %267, %cst_207 {dimension_numbers = #tpu.dot_dimension_numbers<[1], [0], [0], [1], [0, 0, 1, 1], [], []>} : vector<16x128xbf16>, vector<128x128xbf16>, vector<16x128xf32> -> vector<16x128xf32>
    %c0_208 = arith.constant 0 : index
    %c0_209 = arith.constant 0 : index
    %269 = vector.load %arg9[%c0_208, %c0_209] : memref<1x128xf32, #tpu.memory_space<vmem>>, vector<1x128xf32>
    %270 = vector.broadcast %269 : vector<1x128xf32> to vector<16x128xf32>
    %271 = arith.addf %268, %270 : vector<16x128xf32>
    %cst_210 = arith.constant 0.000000e+00 : f32
    %272 = vector.broadcast %cst_210 : f32 to vector<16x128xf32>
    %273 = arith.maximumf %271, %272 : vector<16x128xf32>
    %274 = arith.truncf %273 : vector<16x128xf32> to vector<16x128xbf16>
    %c0_211 = arith.constant 0 : index
    %c0_212 = arith.constant 0 : index
    %275 = vector.load %arg10[%c0_211, %c0_212] : memref<128x128xbf16, #tpu.memory_space<vmem>>, vector<128x128xbf16>
    %cst_213 = arith.constant dense<0.000000e+00> : vector<16x128xf32>
    %276 = tpu.matmul %274, %275, %cst_213 {dimension_numbers = #tpu.dot_dimension_numbers<[1], [0], [0], [1], [0, 0, 1, 1], [], []>} : vector<16x128xbf16>, vector<128x128xbf16>, vector<16x128xf32> -> vector<16x128xf32>
    %c0_214 = arith.constant 0 : index
    %c0_215 = arith.constant 0 : index
    %277 = vector.load %arg11[%c0_214, %c0_215] : memref<1x128xf32, #tpu.memory_space<vmem>>, vector<1x128xf32>
    %278 = vector.broadcast %277 : vector<1x128xf32> to vector<16x128xf32>
    %279 = arith.addf %276, %278 : vector<16x128xf32>
    %c0_216 = arith.constant 0 : index
    %c0_217 = arith.constant 0 : index
    %280 = vector.load %arg12[%c0_216, %c0_217] : memref<16x128xf32, #tpu.memory_space<vmem>>, vector<16x128xf32>
    tpu.vector_store %arg12[%c0_216, %c0_217], %279 {strides = array<i32>} : memref<16x128xf32, #tpu.memory_space<vmem>>, vector<16x128xf32>,
    return
  }
}

</mosaic_0001>

<bundles_post_ra>
// kernel: tpu_custom_call.1
= control target key start
LH: loop header
LB: loop body
LE: loop exit
PB: predicated region body
PF: predicated region fallthrough
CT: control target
= control target key end

     0   :  { %17 = vsyncpa [#allocation3], 0  ;;  %s6906_s0 = inlined_call_operand.hbm [shape: bf16[16,16], index: 0, kind: input, shape index: {}]   ;;  %s6907_s1 = inlined_call_operand.hbm [shape: bf16[16,16], index: 1, kind: input, shape index: {}]   ;;  %s6908_s2 = inlined_call_operand.hbm [shape: bf16[16,16], index: 2, kind: input, shape index: {}]   ;;  %s6909_s3 = inlined_call_operand.hbm [shape: bf16[16,16], index: 3, kind: input, shape index: {}]   ;;  %s6910_s4 = inlined_call_operand.hbm [shape: bf16[16,128], index: 4, kind: input, shape index: {}]   ;;  %s6911_s5 = inlined_call_operand.hbm [shape: f32[1,128], index: 5, kind: input, shape index: {}]   ;;  %s6912_s6 = inlined_call_operand.hbm [shape: bf16[2,11,256,128], index: 6, kind: input, shape index: {}]   ;;  %s6913_s7 = inlined_call_operand.hbm [shape: f32[2,11,1,128], index: 7, kind: input, shape index: {}]   ;;  %s6914_s8 = inlined_call_operand.hbm [shape: bf16[128,128], index: 8, kind: input, shape index: {}]   ;;  %s6915_s9 = inlined_call_operand.hbm [shape: f32[1,128], index: 9, kind: input, shape index: {}]   ;;  %s6916_s10 = inlined_call_operand.hbm [shape: bf16[128,128], index: 10, kind: input, shape index: {}]   ;;  %s6917_s11 = inlined_call_operand.hbm [shape: f32[1,128], index: 11, kind: input, shape index: {}]   ;;  %s6918_s12 = inlined_call_operand.hbm [shape: f32[16,128], index: 12, kind: output, shape index: {}]  }
   0x1   :  { %18 = vsyncpa [#allocation6], 0 }
   0x2   :  { %19 = vsyncpa [#allocation9], 0 }
   0x3   :  { %20 = vsyncpa [#allocation12], 0 }
   0x4   :  { %21 = vsyncpa [#allocation15], 0 }
   0x5   :  { %22 = vsyncpa [#allocation18], 0 }
   0x6   :  { %23 = vsyncpa [#allocation21], 0 }
   0x7   :  { %24 = vsyncpa [#allocation4], 0  ;;  %s6493_s21 = smov [#allocation5]   ;;  %s6494_s23 = smov [#allocation8]  }
   0x8   :  { %s42_s22 = sshll.u32 %s6493_s21, 4  ;;  %s66_s24 = sshll.u32 %s6494_s23, 4  ;;  %s43_s22 = int_to_ptr.vmem [resolvable:$true] %s42_s22  ;;  %s67_s24 = int_to_ptr.vmem [resolvable:$true] %s66_s24 }
   0x9   :  { %s6225_s25 = scalar_lea.vmem %s43_s22, 128  ;;  %p6230_p1 = scmp.lt.s32.totalorder %s43_s22, %s43_s22 }
   0xa   :  { %p6226_p0 = scmp.ne.s32.totalorder %s43_s22, %s6225_s25  ;;  %p6231_p2 = scmp.lt.s32.totalorder %s6225_s25, %s6225_s25 }
   0xc   :  { %p6232_p3 = por %p6231_p2, %p6230_p1 }
   0xe   :  { %p6233_p4 = pnand %p6232_p3, %p6226_p0 }
  0x10   :  { %6236 = shalt.err (!%p6233_p4)
}
  0x11   :  { %s6495_s26 = smov 64   ;;  %s6496_s27 = smov 4  }
  0x12   :  { %48 = dma.hbm_to_vmem [thread:$0]  %s6907_s1, 128, %s43_s22, [#allocation6], %s6495_s26, %s6495_s26, %s6496_s27  }
  0x13   :  { %s6245_s30 = scalar_lea.vmem %s67_s24, 128  ;;  %p6250_p6 = scmp.lt.s32.totalorder %s67_s24, %s67_s24 }
  0x14   :  { %p6246_p5 = scmp.ne.s32.totalorder %s67_s24, %s6245_s30  ;;  %p6251_p7 = scmp.lt.s32.totalorder %s6245_s30, %s6245_s30 }
  0x16   :  { %p6252_p8 = por %p6251_p7, %p6250_p6 }
  0x18   :  { %p6253_p9 = pnand %p6252_p8, %p6246_p5 }
  0x1a   :  { %6256 = shalt.err (!%p6253_p9)
}
  0x1b   :  { %72 = dma.hbm_to_vmem [thread:$0]  %s6909_s3, 128, %s67_s24, [#allocation9], %s6495_s26, %s6495_s26, %s6496_s27  }
  0x1c   :  { %s6497_s15 = smov [#allocation11]   ;;  %s6498_s17 = smov [#allocation14]  }
  0x1d   :  { %s91_s16 = sshll.u32 %s6497_s15, 4  ;;  %s112_s18 = sshll.u32 %s6498_s17, 4  ;;  %s92_s16 = int_to_ptr.vmem [resolvable:$true] %s91_s16  ;;  %s113_s18 = int_to_ptr.vmem [resolvable:$true] %s112_s18 }
  0x1e   :  { %s6265_s1 = scalar_lea.vmem %s92_s16, 16  ;;  %s6269_s19 = scalar_lea.vmem %s92_s16, 32 }
  0x1f   :  { %p6266_p10 = scmp.ne.s32.totalorder %s92_s16, %s6265_s1  ;;  %p6270_p11 = scmp.lt.s32.totalorder %s92_s16, %s92_s16 }
  0x20   :  { %p6271_p12 = scmp.lt.s32.totalorder %s6269_s19, %s6265_s1 }
  0x22   :  { %p6272_p13 = por %p6271_p12, %p6270_p11 }
  0x24   :  { %p6273_p0 = pnand %p6272_p13, %p6266_p10 }
  0x26   :  { %6276 = shalt.err (!%p6273_p0)
}
  0x27   :  { %94 = dma.hbm_to_vmem [thread:$0]  %s6911_s5, 16, %s92_s16, [#allocation12]  }
  0x28   :  { %s6285_s22 = scalar_lea.vmem %s113_s18, 352  ;;  %p6290_p2 = scmp.lt.s32.totalorder %s113_s18, %s113_s18 }
  0x29   :  { %p6286_p1 = scmp.ne.s32.totalorder %s113_s18, %s6285_s22  ;;  %p6291_p3 = scmp.lt.s32.totalorder %s6285_s22, %s6285_s22 }
  0x2b   :  { %p6292_p4 = por %p6291_p3, %p6290_p2 }
  0x2d   :  { %p6293_p5 = pnand %p6292_p4, %p6286_p1 }
  0x2f   :  { %6296 = shalt.err (!%p6293_p5)
}
  0x30   :  { %s6499_s3 = smov 16   ;;  %s6500_s23 = smov 1  }
  0x31   :  { %118 = dma.hbm_to_vmem [thread:$0]  %s6913_s7, 352, %s113_s18, [#allocation15], %s6499_s3, %s6499_s3, %s6500_s23  }
  0x32   :  { %s6501_s28 = smov [#allocation17]   ;;  %s6502_s30 = smov [#allocation2]  }
  0x33   :  { %s137_s29 = sshll.u32 %s6501_s28, 4  ;;  %s30_s13 = sshll.u32 %s6502_s30, 4  ;;  %s138_s29 = int_to_ptr.vmem [resolvable:$true] %s137_s29  ;;  %s31_s13 = int_to_ptr.vmem [resolvable:$true] %s30_s13 }
  0x34   :  { %s6305_s5 = scalar_lea.vmem %s138_s29, 16  ;;  %s6309_s14 = scalar_lea.vmem %s138_s29, 32 }
  0x35   :  { %p6306_p6 = scmp.ne.s32.totalorder %s138_s29, %s6305_s5  ;;  %p6310_p7 = scmp.lt.s32.totalorder %s138_s29, %s138_s29 }
  0x36   :  { %p6311_p8 = scmp.lt.s32.totalorder %s6309_s14, %s6305_s5 }
  0x38   :  { %p6312_p9 = por %p6311_p8, %p6310_p7 }
  0x3a   :  { %p6313_p10 = pnand %p6312_p9, %p6306_p6 }
  0x3c   :  { %6316 = shalt.err (!%p6313_p10)
}
  0x3d   :  { %140 = dma.hbm_to_vmem [thread:$0]  %s6915_s9, 16, %s138_s29, [#allocation18]  }
  0x3e   :  { %s6325_s17 = scalar_lea.vmem %s31_s13, 128  ;;  %p6330_p12 = scmp.lt.s32.totalorder %s31_s13, %s31_s13 }
  0x3f   :  { %p6326_p11 = scmp.ne.s32.totalorder %s31_s13, %s6325_s17  ;;  %p6331_p13 = scmp.lt.s32.totalorder %s6325_s17, %s6325_s17 }
  0x41   :  { %p6332_p0 = por %p6331_p13, %p6330_p12 }
  0x43   :  { %p6333_p1 = pnand %p6332_p0, %p6326_p11 }
  0x45   :  { %6336 = shalt.err (!%p6333_p1)
}
  0x46   :  { %36 = dma.hbm_to_vmem [thread:$0]  %s6906_s0, 128, %s31_s13, [#allocation3], %s6495_s26, %s6495_s26, %s6496_s27  }
  0x47   :  { %s6503_s1 = smov [#allocation7]   ;;  %s6504_s20 = smov [#allocation10]  }
  0x48   :  { %s54_s19 = sshll.u32 %s6503_s1, 4  ;;  %s78_s21 = sshll.u32 %s6504_s20, 4  ;;  %s55_s19 = int_to_ptr.vmem [resolvable:$true] %s54_s19  ;;  %s79_s21 = int_to_ptr.vmem [resolvable:$true] %s78_s21 }
  0x49   :  { %s6345_s9 = scalar_lea.vmem %s55_s19, 128  ;;  %p6350_p3 = scmp.lt.s32.totalorder %s55_s19, %s55_s19 }
  0x4a   :  { %p6346_p2 = scmp.ne.s32.totalorder %s55_s19, %s6345_s9  ;;  %p6351_p4 = scmp.lt.s32.totalorder %s6345_s9, %s6345_s9 }
  0x4c   :  { %p6352_p5 = por %p6351_p4, %p6350_p3 }
  0x4e   :  { %p6353_p6 = pnand %p6352_p5, %p6346_p2 }
  0x50   :  { %6356 = shalt.err (!%p6353_p6)
}
  0x51   :  { %60 = dma.hbm_to_vmem [thread:$0]  %s6908_s2, 128, %s55_s19, [#allocation6], %s6495_s26, %s6495_s26, %s6496_s27  }
  0x52   :  { %s6365_s0 = scalar_lea.vmem %s79_s21, 128  ;;  %p6370_p8 = scmp.lt.s32.totalorder %s79_s21, %s79_s21 }
  0x53   :  { %p6366_p7 = scmp.ne.s32.totalorder %s79_s21, %s6365_s0  ;;  %p6371_p9 = scmp.lt.s32.totalorder %s6365_s0, %s6365_s0 }
  0x55   :  { %p6372_p10 = por %p6371_p9, %p6370_p8 }
  0x57   :  { %p6373_p11 = pnand %p6372_p10, %p6366_p7 }
  0x59   :  { %6376 = shalt.err (!%p6373_p11)
}
  0x5a   :  { %84 = dma.hbm_to_vmem [thread:$0]  %s6910_s4, 128, %s79_s21, [#allocation9], %s6495_s26, %s6495_s26, %s6496_s27  }
  0x5b   :  { %s6505_s25 = smov [#allocation13]   ;;  %s6506_s29 = smov [#allocation16]  }
  0x5c   :  { %s100_s28 = sshll.u32 %s6505_s25, 4  ;;  %s124_s30 = sshll.u32 %s6506_s29, 4  ;;  %s101_s28 = int_to_ptr.vmem [resolvable:$true] %s100_s28  ;;  %s125_s30 = int_to_ptr.vmem [resolvable:$true] %s124_s30 }
  0x5d   :  { %s6385_s2 = scalar_lea.vmem %s101_s28, 45056  ;;  %p6390_p13 = scmp.lt.s32.totalorder %s101_s28, %s101_s28 }
  0x5e   :  { %p6386_p12 = scmp.ne.s32.totalorder %s101_s28, %s6385_s2  ;;  %p6391_p0 = scmp.lt.s32.totalorder %s6385_s2, %s6385_s2 }
  0x60   :  { %p6392_p1 = por %p6391_p0, %p6390_p13 }
  0x62   :  { %p6393_p2 = pnand %p6392_p1, %p6386_p12 }
  0x64   :  { %6396 = shalt.err (!%p6393_p2)
}
  0x65   :  { %106 = dma.hbm_to_vmem [thread:$0]  %s6912_s6, 45056, %s101_s28, [#allocation12], %s6495_s26, %s6495_s26, %s6496_s27  }
  0x66   :  { %s6405_s4 = scalar_lea.vmem %s125_s30, 1024  ;;  %p6410_p4 = scmp.lt.s32.totalorder %s125_s30, %s125_s30 }
  0x67   :  { %p6406_p3 = scmp.ne.s32.totalorder %s125_s30, %s6405_s4  ;;  %p6411_p5 = scmp.lt.s32.totalorder %s6405_s4, %s6405_s4 }
  0x69   :  { %p6412_p6 = por %p6411_p5, %p6410_p4 }
  0x6b   :  { %p6413_p7 = pnand %p6412_p6, %p6406_p3 }
  0x6d   :  { %6416 = shalt.err (!%p6413_p7)
}
  0x6e   :  { %130 = dma.hbm_to_vmem [thread:$0]  %s6914_s8, 1024, %s125_s30, [#allocation15], %s6495_s26, %s6495_s26, %s6496_s27  }
  0x6f   :  { %s6507_s16 = smov [#allocation19]   ;;  %s6508_s7 = smov [#allocation20]  }
  0x70   :  { %s146_s17 = sshll.u32 %s6507_s16, 4  ;;  %s159_s18 = sshll.u32 %s6508_s7, 4  ;;  %s147_s17 = int_to_ptr.vmem [resolvable:$true] %s146_s17  ;;  %s160_s18 = int_to_ptr.vmem [resolvable:$true] %s159_s18 }
  0x71   :  { %s6425_s6 = scalar_lea.vmem %s147_s17, 1024  ;;  %p6430_p9 = scmp.lt.s32.totalorder %s147_s17, %s147_s17 }
  0x72   :  { %p6426_p8 = scmp.ne.s32.totalorder %s147_s17, %s6425_s6  ;;  %p6431_p10 = scmp.lt.s32.totalorder %s6425_s6, %s6425_s6 }
  0x74   :  { %p6432_p11 = por %p6431_p10, %p6430_p9 }
  0x76   :  { %p6433_p12 = pnand %p6432_p11, %p6426_p8 }
  0x78   :  { %6436 = shalt.err (!%p6433_p12)
}
  0x79   :  { %152 = dma.hbm_to_vmem [thread:$0]  %s6916_s10, 1024, %s147_s17, [#allocation18], %s6495_s26, %s6495_s26, %s6496_s27  }
  0x7a   :  { %s6445_s8 = scalar_lea.vmem %s160_s18, 16  ;;  %s6449_s20 = scalar_lea.vmem %s160_s18, 32 }
  0x7b   :  { %p6446_p13 = scmp.ne.s32.totalorder %s160_s18, %s6445_s8  ;;  %p6450_p0 = scmp.lt.s32.totalorder %s160_s18, %s160_s18 }
  0x7c   :  { %p6451_p1 = scmp.lt.s32.totalorder %s6449_s20, %s6445_s8 }
  0x7e   :  { %p6452_p2 = por %p6451_p1, %p6450_p0 }
  0x80   :  { %p6453_p3 = pnand %p6452_p2, %p6446_p13 }
  0x82   :  { %6456 = shalt.err (!%p6453_p3)
}
  0x83   :  { %162 = dma.hbm_to_vmem [thread:$0]  %s6917_s11, 16, %s160_s18, [#allocation21]  }
  0x84   :  { %6477 = dma.done.wait [#allocation3], 128  }
  0x85   :  { %6478 = vsyncadd [#allocation3], 4294967168 }
  0x86   :  { %6479 = dma.done.wait [#allocation6], 256  }
  0x87   :  { %6480 = vsyncadd [#allocation6], 4294967040 }
  0x88   :  { %6481 = dma.done.wait [#allocation9], 256  }
  0x89   :  { %6482 = vsyncadd [#allocation9], 4294967040 }
  0x8a   :  { %6483 = dma.done.wait [#allocation12], 45072  }
  0x8b   :  { %6484 = vsyncadd [#allocation12], 4294922224 }
  0x8c   :  { %6485 = dma.done.wait [#allocation15], 1376  }
  0x8d   :  { %6486 = vsyncadd [#allocation15], 4294965920 }
  0x8e   :  { %6487 = dma.done.wait [#allocation18], 1040  }
  0x8f   :  { %6488 = vsyncadd [#allocation18], 4294966256 }
  0x90   :  { %6489 = dma.done.wait [#allocation21], 16  }
  0x91   :  { %6490 = vsyncadd [#allocation21], 4294967280  ;;  %v6919_v0 = vmov 0.0   ;;  %vm6510_vm0 = vmmov 0   ;;  %v5844_v1 = vld [vmem:[#allocation10] sm:$0xff]   ;;  %vm222_vm1 = vcmask 130048  }
  0x92   :  { %5681 = vmatprep.subr.bf16.mxu0 %v6919_v0  ;;  %5683 = vmatprep.mubr.msk.bf16.mxu0 %vm6510_vm0, %v6919_v0  ;;  %v5845_v2 = vld [vmem:[#allocation2] sm:$0xff]   ;;  %v5855_v7 = vld [vmem:[#allocation13 + $0x68] sm:$0xff]   ;;  %v5859_v9 = vld [vmem:[#allocation13 + $0x60] sm:$0xff]   ;;  %v6511_v49 = vmov 0   ;;  %v6512_v51 = vmov 1   ;;  %v6513_v52 = vmov 2  }
  0x93   :  { %5687 = vmatprep.subr.bf16.mxu1 %v6919_v0  ;;  %5689 = vmatprep.mubr.msk.bf16.mxu1 %vm6510_vm0, %v6919_v0  ;;  %v5847_v3 = vld [vmem:[#allocation13 + $0x78] sm:$0xff]   ;;  %v5851_v5 = vld [vmem:[#allocation13 + $0x70] sm:$0xff]   ;;  %v5857_v8 = vld [vmem:[#allocation13 + $0x28] sm:$0xff]   ;;  %v6514_v53 = vmov 3   ;;  %s6522_s10 = smov [#allocation22]  }
  0x94   :  { %5682 = vmatpush3.bf16.msra.mxu0 %v5844_v1  ;;  %v5849_v4 = vld [vmem:[#allocation13 + $0x38] sm:$0xff]   ;;  %v5853_v6 = vld [vmem:[#allocation13 + $0x30] sm:$0xff]   ;;  %v5861_v10 = vld [vmem:[#allocation13 + $0x20] sm:$0xff]   ;;  %5777 = vset.pattern.permute.xlu0 %v6511_v49  ;;  %s4748_s11 = sshll.u32 %s6522_s10, 4  ;;  %s4749_s11 = int_to_ptr.vmem [resolvable:$true] %s4748_s11 }
  0x95   :  { %5175 = vmatprep.subr.bf16.mxu0 %v5847_v3  ;;  %v5863_v11 = vld [vmem:[#allocation13 + $0x58] sm:$0xff]   ;;  %v5867_v13 = vld [vmem:[#allocation13 + $0x50] sm:$0xff]   ;;  %v5871_v15 = vld [vmem:[#allocation13 + $0x48] sm:$0xff]   ;;  %5789 = vset.pattern.permute.xlu1 %v6513_v52  ;;  %s6457_s26 = scalar_lea.vmem %s4749_s11, 256  ;;  %p6462_p5 = scmp.lt.s32.totalorder %s4749_s11, %s4749_s11 }
  0x96   :  { %v5865_v12 = vld [vmem:[#allocation13 + $0x18] sm:$0xff]   ;;  %v5869_v14 = vld [vmem:[#allocation13 + $0x10] sm:$0xff]   ;;  %v5873_v16 = vld [vmem:[#allocation13 + $0x8] sm:$0xff]   ;;  %p6458_p4 = scmp.ne.s32.totalorder %s4749_s11, %s6457_s26  ;;  %p6463_p6 = scmp.lt.s32.totalorder %s6457_s26, %s6457_s26 }
  0x97   :  { %5684 = vmatmul.mubr.msk.bf16.vlgmr.msra.gmra.mxu0 %vm222_vm1, %v5845_v2  ;;  %v4766_v17 = vld [vmem:[#allocation11] ss:$0 sm:$0xff]  ;;  %v5852_v28 = vld [vmem:[#allocation13 + $0xf0] sm:$0xff]   ;;  %v5856_v30 = vld [vmem:[#allocation13 + $0xe8] sm:$0xff]  }
  0x98   :  { %5176 = vmatpush3.bf16.msra.mxu0 %v5849_v4  ;;  %v5848_v21 = vld [vmem:[#allocation13 + $0xf8] sm:$0xff]   ;;  %v5854_v29 = vld [vmem:[#allocation13 + $0xb0] sm:$0xff]   ;;  %v5858_v31 = vld [vmem:[#allocation13 + $0xa8] sm:$0xff]   ;;  %p6464_p7 = por %p6463_p6, %p6462_p5 }
  0x99   :  { %5177 = vmatprep.subr.bf16.mxu0 %v5851_v5  ;;  %v5846_v25 = vld [vmem:[#allocation5] sm:$0xff]   ;;  %v5868_v36 = vld [vmem:[#allocation13 + $0xd0] sm:$0xff]   ;;  %v5872_v38 = vld [vmem:[#allocation13 + $0xc8] sm:$0xff]  }
  0x9a   :  { %v5850_v27 = vld [vmem:[#allocation13 + $0xb8] sm:$0xff]   ;;  %v5860_v32 = vld [vmem:[#allocation13 + $0xe0] sm:$0xff]   ;;  %v5870_v37 = vld [vmem:[#allocation13 + $0x90] sm:$0xff]   ;;  %p6465_p8 = pnand %p6464_p7, %p6458_p4 }
  0x9b   :  { %v5862_v33 = vld [vmem:[#allocation13 + $0xa0] sm:$0xff]   ;;  %v5864_v34 = vld [vmem:[#allocation13 + $0xd8] sm:$0xff]   ;;  %v5874_v39 = vld [vmem:[#allocation13 + $0x88] sm:$0xff]  }
  0x9c   :  { %5178 = vmatpush3.bf16.msra.mxu0 %v5853_v6  ;;  %v5866_v35 = vld [vmem:[#allocation13 + $0x98] sm:$0xff]   ;;  %v5875_v40 = vld [vmem:[#allocation13 + $0x40] sm:$0xff]   ;;  %v5883_v61 = vld [vmem:[#allocation13 + $0x170] sm:$0xff]  }
  0x9d   :  { %5179 = vmatprep.subr.bf16.mxu0 %v5855_v7  ;;  %v5876_v41 = vld [vmem:[#allocation13 + $0xc0] sm:$0xff]   ;;  %v5879_v44 = vld [vmem:[#allocation13 + $0x178] sm:$0xff]   ;;  %v5884_v62 = vld [vmem:[#allocation13 + $0x1f0] sm:$0xff]  }
  0x9e   :  { %v5877_v42 = vld [vmem:[#allocation13] sm:$0xff]   ;;  %v5880_v45 = vld [vmem:[#allocation13 + $0x1f8] sm:$0xff]   ;;  %v5885_v63 = vld [vmem:[#allocation13 + $0x130] sm:$0xff]  }
  0x9f   :  { %v5878_v43 = vld [vmem:[#allocation13 + $0x80] sm:$0xff]   ;;  %v5881_v57 = vld [vmem:[#allocation13 + $0x138] sm:$0xff]   ;;  %v5886_v1 = vld [vmem:[#allocation13 + $0x1b0] sm:$0xff]  }
  0xa0   :  { %5180 = vmatpush3.bf16.msra.mxu0 %v5857_v8  ;;  %v5168_v46 = vld [vmem:[#allocation7] sm:$0xff]   ;;  %v5882_v58 = vld [vmem:[#allocation13 + $0x1b8] sm:$0xff]   ;;  %v6515_v8 = vmov 4   ;;  %v5931_v52 = vld [vmem:[#allocation13 + $0x250] sm:$0xff]  }
  0xa1   :  { %5181 = vmatprep.subr.bf16.mxu0 %v5859_v9  ;;  %v5169_v47 = vunpack.c.l.bf16 %v5168_v46  ;;  %v5170_v48 = vunpack.c.h.bf16 %v5168_v46  ;;  %v5887_v2 = vld [vmem:[#allocation13 + $0x168] sm:$0xff]   ;;  %v5891_v6 = vld [vmem:[#allocation13 + $0x160] sm:$0xff]   ;;  %v6516_v9 = vmov 5   ;;  %v5929_v49 = vld [vmem:[#allocation13 + $0x218] sm:$0xff]  }
  0xa2   :  { %v5888_v3 = vld [vmem:[#allocation13 + $0x1e8] sm:$0xff]   ;;  %v5892_v7 = vld [vmem:[#allocation13 + $0x1e0] sm:$0xff]  }
  0xa3   :  { %v6663_v50 = vpack.i.bf16 %v5170_v48, %v5169_v47  ;;  %v5889_v4 = vld [vmem:[#allocation13 + $0x128] sm:$0xff]   ;;  %v5926_v46 = vld [vmem:[#allocation13 + $0x2a0] sm:$0xff]   ;;  %v5927_v47 = vld [vmem:[#allocation13 + $0x258] sm:$0xff]  }
  0xa4   :  { %5182 = vmatpush3.bf16.msra.mxu0 %v5861_v10  ;;  %v5890_v5 = vld [vmem:[#allocation13 + $0x1a8] sm:$0xff]   ;;  %v5893_v10 = vld [vmem:[#allocation13 + $0x120] sm:$0xff]   ;;  %v5928_v48 = vld [vmem:[#allocation13 + $0x2d8] sm:$0xff]  }
  0xa5   :  { %5183 = vmatprep.subr.bf16.mxu0 %v5863_v11  ;;  %5779 = vperm.xlu0 %5777, %v6663_v50   ;;  %v5894_v11 = vld [vmem:[#allocation13 + $0x1a0] sm:$0xff]  }
  0xa6   :  { %5791 = vperm.xlu1 %5789, %v6663_v50  }
  0xa8   :  { %5184 = vmatpush3.bf16.msra.mxu0 %v5865_v12  ;;  %v5895_v12 = vld [vmem:[#allocation13 + $0x158] sm:$0xff]  }
  0xa9   :  { %5185 = vmatprep.subr.bf16.mxu0 %v5867_v13  ;;  %5783 = vset.pattern.permute.xlu0 %v6512_v51  ;;  %v5896_v13 = vld [vmem:[#allocation13 + $0x1d8] sm:$0xff]  }
  0xaa   :  { %5785 = vperm.xlu0 %5783, %v6663_v50   ;;  %5795 = vset.pattern.permute.xlu1 %v6514_v53  ;;  %v5930_v51 = vld [vmem:[#allocation13 + $0x298] sm:$0xff]   ;;  %v5932_v53 = vld [vmem:[#allocation13 + $0x2d0] sm:$0xff]  }
  0xab   :  { %5797 = vperm.xlu1 %5795, %v6663_v50  }
  0xac   :  { %5186 = vmatpush3.bf16.msra.mxu0 %v5869_v14  ;;  %v5897_v14 = vld [vmem:[#allocation13 + $0x118] sm:$0xff]  }
  0xad   :  { %5187 = vmatprep.subr.bf16.mxu0 %v5871_v15  ;;  %v5898_v15 = vld [vmem:[#allocation13 + $0x198] sm:$0xff]  }
  0xae   :  { %5807 = vset.pattern.permute.xlu0 %v6516_v9  ;;  %v5950_v9 = vld [vmem:[#allocation13 + $0x3b0] sm:$0xff]  }
  0xaf   :  { %5801 = vset.pattern.permute.xlu1 %v6515_v8  ;;  %5809 = vperm.xlu0 %5807, %v6663_v50   ;;  %v5949_v8 = vld [vmem:[#allocation13 + $0x330] sm:$0xff]  }
  0xb0   :  { %5188 = vmatpush3.bf16.msra.mxu0 %v5873_v16  ;;  %5803 = vperm.xlu1 %5801, %v6663_v50   ;;  %v5899_v16 = vld [vmem:[#allocation13 + $0x150] sm:$0xff]  }
  0xb1   :  { %5189 = vmatprep.subr.bf16.mxu0 %v5875_v40  ;;  %v5921_v40 = vld [vmem:[#allocation13 + $0x228] sm:$0xff]  }
  0xb4   :  { %5190 = vmatpush3.bf16.msra.mxu0 %v5877_v42  ;;  %v5923_v42 = vld [vmem:[#allocation13 + $0x260] sm:$0xff]  }
  0xb5   :  { %5219 = vmatprep.subr.bf16.mxu0 %v5879_v44  ;;  %v5925_v44 = vld [vmem:[#allocation13 + $0x220] sm:$0xff]  }
 0x157   :  { %v260_v18 = vpop.f32.mrf.mxu0 }
 0x158   :  { %v261_v22 = vadd.f32 %v4766_v17, %v260_v18  ;;  %v5901_v18 = vld [vmem:[#allocation13 + $0x110] sm:$0xff]  }
 0x159   :  { %v5685_v19 = vpop.f32.mrf.mxu0 }
 0x15a   :  { %v5902_v19 = vld [vmem:[#allocation13 + $0x190] sm:$0xff]  }
 0x15b   :  { %v263_v20 = vpop.f32.mrf.mxu0 }
 0x15c   :  { %v264_v23 = vadd.f32 %v4766_v17, %v263_v20  ;;  %v5900_v17 = vld [vmem:[#allocation13 + $0x1d0] sm:$0xff]   ;;  %v5903_v20 = vld [vmem:[#allocation13 + $0x148] sm:$0xff]  }
 0x15d   :  { %v5686_v24 = vpop.f32.mrf.mxu0 }
 0x15e   :  { %v6657_v26 = vpack.c.bf16 %v264_v23, %v261_v22  ;;  %v5905_v22 = vld [vmem:[#allocation13 + $0x108] sm:$0xff]   ;;  %v5907_v24 = vld [vmem:[#allocation13 + $0x140] sm:$0xff]  }
 0x15f   :  { %v5906_v23 = vld [vmem:[#allocation13 + $0x188] sm:$0xff]  }
 0x160   :  { %5688 = vmatpush3.bf16.msra.mxu1 %v6657_v26  ;;  %491 = vmatprep.mubr.bf16.mxu0 %v6657_v26 }
 0x161   :  { %5197 = vmatprep.subr.bf16.mxu1 %v5848_v21  ;;  %v5904_v21 = vld [vmem:[#allocation13 + $0x1c8] sm:$0xff]  }
 0x163   :  { %5690 = vmatmul.mubr.msk.bf16.vlgmr.msra.gmra.mxu1 %vm222_vm1, %v5846_v25  ;;  %v5908_v25 = vld [vmem:[#allocation13 + $0x1c0] sm:$0xff]  }
 0x164   :  { %683 = vmatprep.mubr.bf16.mxu1 %v6657_v26  ;;  %5198 = vmatpush3.bf16.msra.mxu1 %v5850_v27  ;;  %v5909_v27 = vld [vmem:[#allocation13 + $0x100] sm:$0xff]  }
 0x165   :  { %5199 = vmatprep.subr.bf16.mxu1 %v5852_v28  ;;  %v5910_v28 = vld [vmem:[#allocation13 + $0x180] sm:$0xff]  }
 0x168   :  { %5200 = vmatpush3.bf16.msra.mxu1 %v5854_v29  ;;  %v5911_v29 = vld [vmem:[#allocation13 + $0x278] sm:$0xff]  }
 0x169   :  { %5201 = vmatprep.subr.bf16.mxu1 %v5856_v30  ;;  %v5912_v30 = vld [vmem:[#allocation13 + $0x2f8] sm:$0xff]  }
 0x16c   :  { %5202 = vmatpush3.bf16.msra.mxu1 %v5858_v31  ;;  %v5913_v31 = vld [vmem:[#allocation13 + $0x238] sm:$0xff]  }
 0x16d   :  { %5203 = vmatprep.subr.bf16.mxu1 %v5860_v32  ;;  %v5914_v32 = vld [vmem:[#allocation13 + $0x2b8] sm:$0xff]  }
 0x170   :  { %5204 = vmatpush3.bf16.msra.mxu1 %v5862_v33  ;;  %v5915_v33 = vld [vmem:[#allocation13 + $0x270] sm:$0xff]  }
 0x171   :  { %5205 = vmatprep.subr.bf16.mxu1 %v5864_v34  ;;  %v5916_v34 = vld [vmem:[#allocation13 + $0x2f0] sm:$0xff]  }
 0x174   :  { %5206 = vmatpush3.bf16.msra.mxu1 %v5866_v35  ;;  %v5917_v35 = vld [vmem:[#allocation13 + $0x230] sm:$0xff]  }
 0x175   :  { %5207 = vmatprep.subr.bf16.mxu1 %v5868_v36  ;;  %v5918_v36 = vld [vmem:[#allocation13 + $0x2b0] sm:$0xff]  }
 0x178   :  { %5208 = vmatpush3.bf16.msra.mxu1 %v5870_v37  ;;  %v5919_v37 = vld [vmem:[#allocation13 + $0x268] sm:$0xff]  }
 0x179   :  { %5209 = vmatprep.subr.bf16.mxu1 %v5872_v38  ;;  %v5920_v38 = vld [vmem:[#allocation13 + $0x2e8] sm:$0xff]  }
 0x17c   :  { %5210 = vmatpush3.bf16.msra.mxu1 %v5874_v39  ;;  %v6517_v39 = vmov 6  }
 0x17d   :  { %5211 = vmatprep.subr.bf16.mxu1 %v5876_v41  ;;  %5813 = vset.pattern.permute.xlu1 %v6517_v39  ;;  %v5922_v41 = vld [vmem:[#allocation13 + $0x2a8] sm:$0xff]   ;;  %v5977_v39 = vld [vmem:[#allocation13 + $0x438] sm:$0xff]  }
 0x17e   :  { %5815 = vperm.xlu1 %5813, %v6663_v50  }
 0x180   :  { %5212 = vmatpush3.bf16.msra.mxu1 %v5878_v43  ;;  %v5924_v43 = vld [vmem:[#allocation13 + $0x2e0] sm:$0xff]  }
 0x181   :  { %5241 = vmatprep.subr.bf16.mxu1 %v5880_v45  ;;  %v6518_v45 = vmov 7  }
 0x182   :  { %5819 = vset.pattern.permute.xlu1 %v6518_v45  ;;  %v5983_v45 = vld [vmem:[#allocation13 + $0x468] sm:$0xff]  }
 0x183   :  { %5821 = vperm.xlu1 %5819, %v6663_v50  }
 0x223   :  { %v316_v54 = vpop.f32.mrf.mxu1 }
 0x225   :  { %v5691_v55 = vpop.f32.mrf.mxu1 }
 0x226   :  { %v5934_v55 = vld [vmem:[#allocation13 + $0x290] sm:$0xff]  }
 0x227   :  { %v319_v56 = vpop.f32.mrf.mxu1 }
 0x228   :  { %v6669_v59 = vpack.c.bf16 %v319_v56, %v316_v54  ;;  %v5933_v54 = vld [vmem:[#allocation13 + $0x210] sm:$0xff]   ;;  %v5935_v56 = vld [vmem:[#allocation13 + $0x248] sm:$0xff]  }
 0x229   :  { %v5692_v60 = vpop.f32.mrf.mxu1 }
 0x22a   :  { %492 = vmatmul.mubr.bf16.vlgmr.msra.gmra.mxu0 %v6669_v59  ;;  %684 = vmatmul.mubr.bf16.vlgmr.msra.gmra.mxu1 %v6669_v59  ;;  %v5938_v60 = vld [vmem:[#allocation13 + $0x288] sm:$0xff]  }
 0x22b   :  { %5220 = vmatpush3.bf16.msra.mxu0 %v5881_v57  ;;  %5242 = vmatpush3.bf16.msra.mxu1 %v5882_v58  ;;  %v5936_v57 = vld [vmem:[#allocation13 + $0x2c8] sm:$0xff]  }
 0x22c   :  { %873 = vmatprep.mubr.bf16.mxu0 %v6657_v26  ;;  %1063 = vmatprep.mubr.bf16.mxu1 %v6657_v26  ;;  %v5937_v58 = vld [vmem:[#allocation13 + $0x208] sm:$0xff]  }
 0x22d   :  { %5221 = vmatprep.subr.bf16.mxu0 %v5883_v61  ;;  %5243 = vmatprep.subr.bf16.mxu1 %v5884_v62  ;;  %v5939_v61 = vld [vmem:[#allocation13 + $0x240] sm:$0xff]  }
 0x22e   :  { %v5940_v62 = vld [vmem:[#allocation13 + $0x2c0] sm:$0xff]  }
 0x22f   :  { %5222 = vmatpush3.bf16.msra.mxu0 %v5885_v63  ;;  %5244 = vmatpush3.bf16.msra.mxu1 %v5886_v1  ;;  %v5941_v63 = vld [vmem:[#allocation13 + $0x200] sm:$0xff]  }
 0x230   :  { %5223 = vmatprep.subr.bf16.mxu0 %v5887_v2  ;;  %5245 = vmatprep.subr.bf16.mxu1 %v5888_v3  ;;  %v5942_v1 = vld [vmem:[#allocation13 + $0x280] sm:$0xff]   ;;  %v5943_v2 = vld [vmem:[#allocation13 + $0x378] sm:$0xff]  }
 0x231   :  { %v5944_v3 = vld [vmem:[#allocation13 + $0x3f8] sm:$0xff]  }
 0x233   :  { %5224 = vmatpush3.bf16.msra.mxu0 %v5889_v4  ;;  %5246 = vmatpush3.bf16.msra.mxu1 %v5890_v5  ;;  %v5945_v4 = vld [vmem:[#allocation13 + $0x338] sm:$0xff]  }
 0x234   :  { %5225 = vmatprep.subr.bf16.mxu0 %v5891_v6  ;;  %5247 = vmatprep.subr.bf16.mxu1 %v5892_v7  ;;  %v5946_v5 = vld [vmem:[#allocation13 + $0x3b8] sm:$0xff]   ;;  %v5947_v6 = vld [vmem:[#allocation13 + $0x370] sm:$0xff]  }
 0x235   :  { %v5948_v7 = vld [vmem:[#allocation13 + $0x3f0] sm:$0xff]  }
 0x237   :  { %5226 = vmatpush3.bf16.msra.mxu0 %v5893_v10  ;;  %5248 = vmatpush3.bf16.msra.mxu1 %v5894_v11  ;;  %v5951_v10 = vld [vmem:[#allocation13 + $0x368] sm:$0xff]  }
 0x238   :  { %5227 = vmatprep.subr.bf16.mxu0 %v5895_v12  ;;  %5249 = vmatprep.subr.bf16.mxu1 %v5896_v13  ;;  %v5952_v11 = vld [vmem:[#allocation13 + $0x3e8] sm:$0xff]  }
 0x239   :  { %v5953_v12 = vld [vmem:[#allocation13 + $0x328] sm:$0xff]  }
 0x23a   :  { %v5954_v13 = vld [vmem:[#allocation13 + $0x3a8] sm:$0xff]  }
 0x23b   :  { %5228 = vmatpush3.bf16.msra.mxu0 %v5897_v14  ;;  %5250 = vmatpush3.bf16.msra.mxu1 %v5898_v15  ;;  %v5955_v14 = vld [vmem:[#allocation13 + $0x360] sm:$0xff]  }
 0x23c   :  { %5229 = vmatprep.subr.bf16.mxu0 %v5899_v16  ;;  %5251 = vmatprep.subr.bf16.mxu1 %v5900_v17  ;;  %v5956_v15 = vld [vmem:[#allocation13 + $0x3e0] sm:$0xff]  }
 0x23d   :  { %v5957_v16 = vld [vmem:[#allocation13 + $0x320] sm:$0xff]  }
 0x23e   :  { %v5958_v17 = vld [vmem:[#allocation13 + $0x3a0] sm:$0xff]  }
 0x23f   :  { %5230 = vmatpush3.bf16.msra.mxu0 %v5901_v18  ;;  %5252 = vmatpush3.bf16.msra.mxu1 %v5902_v19  ;;  %v5959_v18 = vld [vmem:[#allocation13 + $0x358] sm:$0xff]  }
 0x240   :  { %5231 = vmatprep.subr.bf16.mxu0 %v5903_v20  ;;  %5253 = vmatprep.subr.bf16.mxu1 %v5904_v21  ;;  %v5960_v19 = vld [vmem:[#allocation13 + $0x3d8] sm:$0xff]   ;;  %v6519_v20 = vmov 9   ;;  %v6520_v21 = vmov 8  }
 0x241   :  { %5831 = vset.pattern.permute.xlu1 %v6519_v20  ;;  %5825 = vset.pattern.permute.xlu0 %v6520_v21  ;;  %v6020_v20 = vld [vmem:[#allocation13 + $0x508] sm:$0xff]   ;;  %v6021_v21 = vld [vmem:[#allocation13 + $0x540] sm:$0xff]  }
 0x242   :  { %5833 = vperm.xlu1 %5831, %v6663_v50   ;;  %5827 = vperm.xlu0 %5825, %v6663_v50  }
 0x243   :  { %5232 = vmatpush3.bf16.msra.mxu0 %v5905_v22  ;;  %5254 = vmatpush3.bf16.msra.mxu1 %v5906_v23  ;;  %v5961_v22 = vld [vmem:[#allocation13 + $0x318] sm:$0xff]  }
 0x244   :  { %5233 = vmatprep.subr.bf16.mxu0 %v5907_v24  ;;  %5255 = vmatprep.subr.bf16.mxu1 %v5908_v25  ;;  %v5962_v23 = vld [vmem:[#allocation13 + $0x398] sm:$0xff]   ;;  %v5963_v24 = vld [vmem:[#allocation13 + $0x350] sm:$0xff]  }
 0x245   :  { %v5964_v25 = vld [vmem:[#allocation13 + $0x3d0] sm:$0xff]  }
 0x247   :  { %5234 = vmatpush3.bf16.msra.mxu0 %v5909_v27  ;;  %5256 = vmatpush3.bf16.msra.mxu1 %v5910_v28  ;;  %v5965_v27 = vld [vmem:[#allocation13 + $0x310] sm:$0xff]  }
 0x248   :  { %5263 = vmatprep.subr.bf16.mxu0 %v5911_v29  ;;  %5285 = vmatprep.subr.bf16.mxu1 %v5912_v30  ;;  %v5966_v28 = vld [vmem:[#allocation13 + $0x390] sm:$0xff]   ;;  %v5967_v29 = vld [vmem:[#allocation13 + $0x348] sm:$0xff]  }
 0x249   :  { %v5968_v30 = vld [vmem:[#allocation13 + $0x3c8] sm:$0xff]  }
 0x24a   :  { %874 = vmatmul.mubr.bf16.vlgmr.msra.gmra.mxu0 %v6669_v59  ;;  %1064 = vmatmul.mubr.bf16.vlgmr.msra.gmra.mxu1 %v6669_v59 }
 0x24b   :  { %5264 = vmatpush3.bf16.msra.mxu0 %v5913_v31  ;;  %1253 = vmatprep.mubr.bf16.mxu0 %v6657_v26  ;;  %v5969_v31 = vld [vmem:[#allocation13 + $0x308] sm:$0xff]  }
 0x24c   :  { %5286 = vmatpush3.bf16.msra.mxu1 %v5914_v32  ;;  %1443 = vmatprep.mubr.bf16.mxu1 %v6657_v26  ;;  %v5970_v32 = vld [vmem:[#allocation13 + $0x388] sm:$0xff]  }
 0x24d   :  { %5265 = vmatprep.subr.bf16.mxu0 %v5915_v33  ;;  %5287 = vmatprep.subr.bf16.mxu1 %v5916_v34  ;;  %v5971_v33 = vld [vmem:[#allocation13 + $0x340] sm:$0xff]  }
 0x24e   :  { %v5972_v34 = vld [vmem:[#allocation13 + $0x3c0] sm:$0xff]  }
 0x24f   :  { %5266 = vmatpush3.bf16.msra.mxu0 %v5917_v35  ;;  %v5973_v35 = vld [vmem:[#allocation13 + $0x300] sm:$0xff]  }
 0x250   :  { %5288 = vmatpush3.bf16.msra.mxu1 %v5918_v36  ;;  %5267 = vmatprep.subr.bf16.mxu0 %v5919_v37  ;;  %v5974_v36 = vld [vmem:[#allocation13 + $0x380] sm:$0xff]   ;;  %v5975_v37 = vld [vmem:[#allocation13 + $0x478] sm:$0xff]  }
 0x251   :  { %5289 = vmatprep.subr.bf16.mxu1 %v5920_v38  ;;  %v5976_v38 = vld [vmem:[#allocation13 + $0x4f8] sm:$0xff]  }
 0x253   :  { %5268 = vmatpush3.bf16.msra.mxu0 %v5921_v40  ;;  %v5978_v40 = vld [vmem:[#allocation13 + $0x4b8] sm:$0xff]  }
 0x254   :  { %5290 = vmatpush3.bf16.msra.mxu1 %v5922_v41  ;;  %5269 = vmatprep.subr.bf16.mxu0 %v5923_v42  ;;  %v5979_v41 = vld [vmem:[#allocation13 + $0x470] sm:$0xff]  }
 0x255   :  { %5291 = vmatprep.subr.bf16.mxu1 %v5924_v43  ;;  %v5980_v42 = vld [vmem:[#allocation13 + $0x4f0] sm:$0xff]  }
 0x256   :  { %v5981_v43 = vld [vmem:[#allocation13 + $0x430] sm:$0xff]  }
 0x257   :  { %5270 = vmatpush3.bf16.msra.mxu0 %v5925_v44  ;;  %v5982_v44 = vld [vmem:[#allocation13 + $0x4b0] sm:$0xff]  }
 0x258   :  { %5292 = vmatpush3.bf16.msra.mxu1 %v5926_v46  ;;  %5271 = vmatprep.subr.bf16.mxu0 %v5927_v47  ;;  %v5984_v46 = vld [vmem:[#allocation13 + $0x4e8] sm:$0xff]  }
 0x259   :  { %5293 = vmatprep.subr.bf16.mxu1 %v5928_v48  ;;  %v5985_v47 = vld [vmem:[#allocation13 + $0x428] sm:$0xff]  }
 0x25a   :  { %v5986_v48 = vld [vmem:[#allocation13 + $0x4a8] sm:$0xff]  }
 0x25b   :  { %5272 = vmatpush3.bf16.msra.mxu0 %v5929_v49  ;;  %v5987_v49 = vld [vmem:[#allocation13 + $0x460] sm:$0xff]  }
 0x25c   :  { %5294 = vmatpush3.bf16.msra.mxu1 %v5930_v51  ;;  %5273 = vmatprep.subr.bf16.mxu0 %v5931_v52  ;;  %v5988_v51 = vld [vmem:[#allocation13 + $0x4e0] sm:$0xff]  }
 0x25d   :  { %5295 = vmatprep.subr.bf16.mxu1 %v5932_v53  ;;  %v5989_v52 = vld [vmem:[#allocation13 + $0x420] sm:$0xff]  }
 0x25e   :  { %v5990_v53 = vld [vmem:[#allocation13 + $0x4a0] sm:$0xff]  }
 0x25f   :  { %5274 = vmatpush3.bf16.msra.mxu0 %v5933_v54  ;;  %v5991_v54 = vld [vmem:[#allocation13 + $0x458] sm:$0xff]  }
 0x260   :  { %5296 = vmatpush3.bf16.msra.mxu1 %v5934_v55  ;;  %5275 = vmatprep.subr.bf16.mxu0 %v5935_v56  ;;  %v5992_v55 = vld [vmem:[#allocation13 + $0x4d8] sm:$0xff]   ;;  %v6521_v56 = vmov 10  }
 0x261   :  { %5297 = vmatprep.subr.bf16.mxu1 %v5936_v57  ;;  %5837 = vset.pattern.permute.xlu1 %v6521_v56  ;;  %v5993_v57 = vld [vmem:[#allocation13 + $0x418] sm:$0xff]  }
 0x262   :  { %5839 = vperm.xlu1 %5837, %v6663_v50   ;;  %5843 = vset.pattern.permute.xlu0 %v6521_v56  ;;  %v6002_v50 = vld [vmem:[#allocation13 + $0x488] sm:$0xff]  }
 0x263   :  { %5276 = vmatpush3.bf16.msra.mxu0 %v5937_v58  ;;  %v5994_v58 = vld [vmem:[#allocation13 + $0x498] sm:$0xff]  }
 0x264   :  { %5298 = vmatpush3.bf16.msra.mxu1 %v5938_v60  ;;  %5277 = vmatprep.subr.bf16.mxu0 %v5939_v61  ;;  %v5995_v60 = vld [vmem:[#allocation13 + $0x450] sm:$0xff]  }
 0x265   :  { %5299 = vmatprep.subr.bf16.mxu1 %v5940_v62  ;;  %v5996_v61 = vld [vmem:[#allocation13 + $0x4d0] sm:$0xff]  }
 0x266   :  { %v5997_v62 = vld [vmem:[#allocation13 + $0x410] sm:$0xff]  }
 0x267   :  { %5278 = vmatpush3.bf16.msra.mxu0 %v5941_v63  ;;  %v5998_v63 = vld [vmem:[#allocation13 + $0x490] sm:$0xff]  }
 0x268   :  { %5300 = vmatpush3.bf16.msra.mxu1 %v5942_v1  ;;  %5307 = vmatprep.subr.bf16.mxu0 %v5943_v2  ;;  %v5999_v1 = vld [vmem:[#allocation13 + $0x448] sm:$0xff]  }
 0x269   :  { %5329 = vmatprep.subr.bf16.mxu1 %v5944_v3  ;;  %v6000_v2 = vld [vmem:[#allocation13 + $0x4c8] sm:$0xff]  }
 0x26a   :  { %1254 = vmatmul.mubr.bf16.vlgmr.msra.gmra.mxu0 %v6669_v59  ;;  %v6001_v3 = vld [vmem:[#allocation13 + $0x408] sm:$0xff]  }
 0x26b   :  { %1444 = vmatmul.mubr.bf16.vlgmr.msra.gmra.mxu1 %v6669_v59  ;;  %5308 = vmatpush3.bf16.msra.mxu0 %v5945_v4  ;;  %v6003_v4 = vld [vmem:[#allocation13 + $0x440] sm:$0xff]  }
 0x26c   :  { %1633 = vmatprep.mubr.bf16.mxu0 %v6657_v26  ;;  %5330 = vmatpush3.bf16.msra.mxu1 %v5946_v5  ;;  %v6004_v5 = vld [vmem:[#allocation13 + $0x4c0] sm:$0xff]  }
 0x26d   :  { %1823 = vmatprep.mubr.bf16.mxu1 %v6657_v26  ;;  %5309 = vmatprep.subr.bf16.mxu0 %v5947_v6  ;;  %v6005_v6 = vld [vmem:[#allocation13 + $0x400] sm:$0xff]  }
 0x26e   :  { %5331 = vmatprep.subr.bf16.mxu1 %v5948_v7  ;;  %v6006_v7 = vld [vmem:[#allocation13 + $0x480] sm:$0xff]  }
 0x26f   :  { %5310 = vmatpush3.bf16.msra.mxu0 %v5949_v8  ;;  %v6007_v8 = vld [vmem:[#allocation13 + $0x578] sm:$0xff]  }
 0x270   :  { %5332 = vmatpush3.bf16.msra.mxu1 %v5950_v9  ;;  %5311 = vmatprep.subr.bf16.mxu0 %v5951_v10  ;;  %v6008_v9 = vld [vmem:[#allocation13 + $0x538] sm:$0xff]   ;;  %v6009_v10 = vld [vmem:[#allocation13 + $0x570] sm:$0xff]  }
 0x271   :  { %5333 = vmatprep.subr.bf16.mxu1 %v5952_v11  ;;  %v6010_v11 = vld [vmem:[#allocation13 + $0x530] sm:$0xff]  }
 0x273   :  { %5312 = vmatpush3.bf16.msra.mxu0 %v5953_v12  ;;  %v6011_v12 = vld [vmem:[#allocation13 + $0x568] sm:$0xff]  }
 0x274   :  { %5334 = vmatpush3.bf16.msra.mxu1 %v5954_v13  ;;  %5313 = vmatprep.subr.bf16.mxu0 %v5955_v14  ;;  %v6012_v13 = vld [vmem:[#allocation13 + $0x528] sm:$0xff]   ;;  %v6013_v14 = vld [vmem:[#allocation13 + $0x560] sm:$0xff]  }
 0x275   :  { %5335 = vmatprep.subr.bf16.mxu1 %v5956_v15  ;;  %v6014_v15 = vld [vmem:[#allocation13 + $0x520] sm:$0xff]  }
 0x277   :  { %5314 = vmatpush3.bf16.msra.mxu0 %v5957_v16  ;;  %v6015_v16 = vld [vmem:[#allocation13 + $0x558] sm:$0xff]  }
 0x278   :  { %5336 = vmatpush3.bf16.msra.mxu1 %v5958_v17  ;;  %5315 = vmatprep.subr.bf16.mxu0 %v5959_v18  ;;  %v6016_v17 = vld [vmem:[#allocation13 + $0x518] sm:$0xff]   ;;  %v6017_v18 = vld [vmem:[#allocation13 + $0x550] sm:$0xff]  }
 0x279   :  { %5337 = vmatprep.subr.bf16.mxu1 %v5960_v19  ;;  %v6018_v19 = vld [vmem:[#allocation13 + $0x510] sm:$0xff]  }
 0x27b   :  { %5316 = vmatpush3.bf16.msra.mxu0 %v5961_v22  ;;  %v6022_v22 = vld [vmem:[#allocation13 + $0x500] sm:$0xff]  }
 0x27c   :  { %5338 = vmatpush3.bf16.msra.mxu1 %v5962_v23  ;;  %5317 = vmatprep.subr.bf16.mxu0 %v5963_v24  ;;  %v6024_v23 = vld [vmem:[#allocation13 + $0x678] sm:$0xff]  }
 0x27d   :  { %5339 = vmatprep.subr.bf16.mxu1 %v5964_v25  ;;  %v6026_v24 = vld [vmem:[#allocation13 + $0x638] sm:$0xff]   ;;  %v6028_v25 = vld [vmem:[#allocation13 + $0x670] sm:$0xff]  }
 0x27f   :  { %5318 = vmatpush3.bf16.msra.mxu0 %v5965_v27  ;;  %v6030_v27 = vld [vmem:[#allocation13 + $0x630] sm:$0xff]  }
 0x280   :  { %5340 = vmatpush3.bf16.msra.mxu1 %v5966_v28  ;;  %5319 = vmatprep.subr.bf16.mxu0 %v5967_v29  ;;  %v6032_v28 = vld [vmem:[#allocation13 + $0x668] sm:$0xff]  }
 0x281   :  { %5341 = vmatprep.subr.bf16.mxu1 %v5968_v30  ;;  %v6034_v29 = vld [vmem:[#allocation13 + $0x628] sm:$0xff]   ;;  %v6036_v30 = vld [vmem:[#allocation13 + $0x660] sm:$0xff]  }
 0x283   :  { %5320 = vmatpush3.bf16.msra.mxu0 %v5969_v31  ;;  %v6038_v31 = vld [vmem:[#allocation13 + $0x620] sm:$0xff]  }
 0x284   :  { %5342 = vmatpush3.bf16.msra.mxu1 %v5970_v32  ;;  %5321 = vmatprep.subr.bf16.mxu0 %v5971_v33  ;;  %v6040_v32 = vld [vmem:[#allocation13 + $0x658] sm:$0xff]  }
 0x285   :  { %5343 = vmatprep.subr.bf16.mxu1 %v5972_v34  ;;  %v6042_v33 = vld [vmem:[#allocation13 + $0x618] sm:$0xff]   ;;  %v6046_v34 = vld [vmem:[#allocation13 + $0x610] sm:$0xff]  }
 0x287   :  { %5322 = vmatpush3.bf16.msra.mxu0 %v5973_v35  ;;  %v6048_v35 = vld [vmem:[#allocation13 + $0x648] sm:$0xff]  }
 0x288   :  { %5344 = vmatpush3.bf16.msra.mxu1 %v5974_v36  ;;  %5351 = vmatprep.subr.bf16.mxu0 %v5975_v37  ;;  %v6050_v36 = vld [vmem:[#allocation13 + $0x608] sm:$0xff]  }
 0x289   :  { %5373 = vmatprep.subr.bf16.mxu1 %v5976_v38 }
 0x28a   :  { %1634 = vmatmul.mubr.bf16.vlgmr.msra.gmra.mxu0 %v6669_v59 }
 0x28b   :  { %1824 = vmatmul.mubr.bf16.vlgmr.msra.gmra.mxu1 %v6669_v59  ;;  %5352 = vmatpush3.bf16.msra.mxu0 %v5977_v39 }
 0x28c   :  { %2013 = vmatprep.mubr.bf16.mxu0 %v6657_v26  ;;  %5374 = vmatpush3.bf16.msra.mxu1 %v5978_v40 }
 0x28d   :  { %2203 = vmatprep.mubr.bf16.mxu1 %v6657_v26  ;;  %5353 = vmatprep.subr.bf16.mxu0 %v5979_v41 }
 0x28e   :  { %5375 = vmatprep.subr.bf16.mxu1 %v5980_v42 }
 0x28f   :  { %5354 = vmatpush3.bf16.msra.mxu0 %v5981_v43 }
 0x290   :  { %5376 = vmatpush3.bf16.msra.mxu1 %v5982_v44  ;;  %5355 = vmatprep.subr.bf16.mxu0 %v5983_v45 }
 0x291   :  { %5377 = vmatprep.subr.bf16.mxu1 %v5984_v46 }
 0x293   :  { %5356 = vmatpush3.bf16.msra.mxu0 %v5985_v47 }
 0x294   :  { %5378 = vmatpush3.bf16.msra.mxu1 %v5986_v48  ;;  %5357 = vmatprep.subr.bf16.mxu0 %v5987_v49 }
 0x295   :  { %5379 = vmatprep.subr.bf16.mxu1 %v5988_v51 }
 0x297   :  { %5358 = vmatpush3.bf16.msra.mxu0 %v5989_v52 }
 0x298   :  { %5380 = vmatpush3.bf16.msra.mxu1 %v5990_v53  ;;  %5359 = vmatprep.subr.bf16.mxu0 %v5991_v54 }
 0x299   :  { %5381 = vmatprep.subr.bf16.mxu1 %v5992_v55 }
 0x29b   :  { %5360 = vmatpush3.bf16.msra.mxu0 %v5993_v57 }
 0x29c   :  { %5382 = vmatpush3.bf16.msra.mxu1 %v5994_v58  ;;  %5361 = vmatprep.subr.bf16.mxu0 %v5995_v60 }
 0x29d   :  { %5383 = vmatprep.subr.bf16.mxu1 %v5996_v61 }
 0x29f   :  { %5362 = vmatpush3.bf16.msra.mxu0 %v5997_v62 }
 0x2a0   :  { %5384 = vmatpush3.bf16.msra.mxu1 %v5998_v63  ;;  %5363 = vmatprep.subr.bf16.mxu0 %v5999_v1  ;;  %v6703_v63 = vpop.permute.xlu0 %5779 }
 0x2a1   :  { %5385 = vmatprep.subr.bf16.mxu1 %v6000_v2 }
 0x2a3   :  { %5364 = vmatpush3.bf16.msra.mxu0 %v6001_v3  ;;  %v6707_v3 = vpop.permute.xlu1 %5791 }
 0x2a4   :  { %5386 = vmatpush3.bf16.msra.mxu1 %v6002_v50  ;;  %5365 = vmatprep.subr.bf16.mxu0 %v6003_v4 }
 0x2a5   :  { %5387 = vmatprep.subr.bf16.mxu1 %v6004_v5 }
 0x2a7   :  { %5366 = vmatpush3.bf16.msra.mxu0 %v6005_v6  ;;  %v4772_v6 = vld [vmem:[#allocation14] ss:$0 sm:$0xff] }
 0x2a8   :  { %5388 = vmatpush3.bf16.msra.mxu1 %v6006_v7  ;;  %5395 = vmatprep.subr.bf16.mxu0 %v6007_v8  ;;  %v4789_v7 = vld [vmem:[#allocation14 + $0x1] ss:$0 sm:$0xff]  ;;  %v6711_v8 = vpop.permute.xlu0 %5785 }
 0x2a9   :  { %5693 = vmatprep.subr.bf16.mxu1 %v6919_v0 }
 0x2aa   :  { %2014 = vmatmul.mubr.bf16.vlgmr.msra.gmra.mxu0 %v6669_v59 }
 0x2ab   :  { %2204 = vmatmul.mubr.bf16.vlgmr.msra.gmra.mxu1 %v6669_v59  ;;  %5396 = vmatpush3.bf16.msra.mxu0 %v6008_v9 }
 0x2ac   :  { %2393 = vmatprep.mubr.bf16.mxu0 %v6657_v26  ;;  %5397 = vmatprep.subr.bf16.mxu0 %v6009_v10  ;;  %v6019_v26 = vld [vmem:[#allocation13 + $0x548] sm:$0xff]  }
 0x2ad   :  { %5695 = vmatprep.mubr.msk.bf16.mxu1 %vm6510_vm0, %v6919_v0 }
 0x2af   :  { %5398 = vmatpush3.bf16.msra.mxu0 %v6010_v11 }
 0x2b0   :  { %5399 = vmatprep.subr.bf16.mxu0 %v6011_v12 }
 0x2b3   :  { %5400 = vmatpush3.bf16.msra.mxu0 %v6012_v13  ;;  %v4806_v13 = vld [vmem:[#allocation14 + $0x2] ss:$0 sm:$0xff] }
 0x2b4   :  { %5401 = vmatprep.subr.bf16.mxu0 %v6013_v14  ;;  %v5781_v14 = vunpack.i.l.bf16 %v6703_v63 }
 0x2b7   :  { %5402 = vmatpush3.bf16.msra.mxu0 %v6014_v15 }
 0x2b8   :  { %5403 = vmatprep.subr.bf16.mxu0 %v6015_v16 }
 0x2bb   :  { %5404 = vmatpush3.bf16.msra.mxu0 %v6016_v17  ;;  %v5787_v17 = vunpack.i.l.bf16 %v6711_v8 }
 0x2bc   :  { %5405 = vmatprep.subr.bf16.mxu0 %v6017_v18 }
 0x2bf   :  { %5406 = vmatpush3.bf16.msra.mxu0 %v6018_v19  ;;  %v6717_v19 = vpop.permute.xlu1 %5797 }
 0x2c0   :  { %5407 = vmatprep.subr.bf16.mxu0 %v6019_v26 }
 0x2c3   :  { %5408 = vmatpush3.bf16.msra.mxu0 %v6020_v20  ;;  %v5793_v20 = vunpack.i.l.bf16 %v6707_v3 }
 0x2c4   :  { %5409 = vmatprep.subr.bf16.mxu0 %v6021_v21 }
 0x2c7   :  { %5410 = vmatpush3.bf16.msra.mxu0 %v6022_v22 }
 0x2c8   :  { %5441 = vmatprep.subr.bf16.mxu0 %v6024_v23  ;;  %v5782_v23 = vunpack.i.h.bf16 %v6703_v63 }
 0x2ca   :  { %2394 = vmatmul.mubr.bf16.vlgmr.msra.gmra.mxu0 %v6669_v59  ;;  %v6044_v59 = vld [vmem:[#allocation13 + $0x650] sm:$0xff]  }
 0x2cb   :  { %5442 = vmatpush3.bf16.msra.mxu0 %v6026_v24  ;;  %v5788_v24 = vunpack.i.h.bf16 %v6711_v8 }
 0x2cc   :  { %5443 = vmatprep.subr.bf16.mxu0 %v6028_v25 }
 0x2cf   :  { %5444 = vmatpush3.bf16.msra.mxu0 %v6030_v27 }
 0x2d0   :  { %5445 = vmatprep.subr.bf16.mxu0 %v6032_v28 }
 0x2d3   :  { %5446 = vmatpush3.bf16.msra.mxu0 %v6034_v29 }
 0x2d4   :  { %5447 = vmatprep.subr.bf16.mxu0 %v6036_v30 }
 0x2d7   :  { %5448 = vmatpush3.bf16.msra.mxu0 %v6038_v31 }
 0x2d8   :  { %5449 = vmatprep.subr.bf16.mxu0 %v6040_v32 }
 0x2db   :  { %5450 = vmatpush3.bf16.msra.mxu0 %v6042_v33 }
 0x2dc   :  { %5451 = vmatprep.subr.bf16.mxu0 %v6044_v59  ;;  %v5794_v59 = vunpack.i.h.bf16 %v6707_v3 }
 0x2df   :  { %5452 = vmatpush3.bf16.msra.mxu0 %v6046_v34  ;;  %v4823_v34 = vld [vmem:[#allocation14 + $0x3] ss:$0 sm:$0xff] }
 0x2e0   :  { %5453 = vmatprep.subr.bf16.mxu0 %v6048_v35 }
 0x2e3   :  { %5454 = vmatpush3.bf16.msra.mxu0 %v6050_v36  ;;  %v4840_v36 = vld [vmem:[#allocation14 + $0x4] ss:$0 sm:$0xff] }
 0x2ea   :  { %v5191_v37 = vpop.f32.mrf.mxu0  ;;  %v5213_v39 = vpop.f32.mrf.mxu1 }
 0x2ec   :  { %v5192_v38 = vpop.f32.mrf.mxu0  ;;  %v5214_v41 = vpop.f32.mrf.mxu1 }
 0x2ed   :  { %v5193_v50 = vadd.f32 %v5192_v38, %v5191_v37  ;;  %v5215_v4 = vadd.f32 %v5214_v41, %v5213_v39  ;;  %v6729_v37 = vpop.permute.xlu1 %5803  ;;  %v6936_v39 = vunpack.i.l.bf16 %v6717_v19 }
 0x2ee   :  { %v5194_v40 = vpop.f32.mrf.mxu0  ;;  %v5216_v43 = vpop.f32.mrf.mxu1 }
 0x2ef   :  { %v494_v15 = vadd.f32 %v5193_v50, %v4772_v6  ;;  %v686_v16 = vadd.f32 %v5215_v4, %v4789_v7  ;;  %v6934_v50 = vunpack.i.h.bf16 %v6717_v19 }
 0x2f0   :  { %v5195_v42 = vpop.f32.mrf.mxu0  ;;  %v5217_v45 = vpop.f32.mrf.mxu1 }
 0x2f1   :  { %v5196_v11 = vadd.f32 %v5195_v42, %v5194_v40  ;;  %v5218_v12 = vadd.f32 %v5217_v45, %v5216_v43  ;;  %v510_v28 = vmul.f32 %v5781_v14, %v494_v15  ;;  %v700_v29 = vmul.f32 %v5787_v17, %v686_v16 }
 0x2f3   :  { %v497_v25 = vadd.f32 %v5196_v11, %v4772_v6  ;;  %v689_v27 = vadd.f32 %v5218_v12, %v4789_v7  ;;  %v6744_v6 = vpop.permute.xlu0 %5809  ;;  %v4857_v7 = vld [vmem:[#allocation14 + $0x5] ss:$0 sm:$0xff]  ;;  %v4874_v12 = vld [vmem:[#allocation14 + $0x6] ss:$0 sm:$0xff] }
 0x2f5   :  { %v511_v40 = vmul.f32 %v5782_v23, %v497_v25  ;;  %v701_v41 = vmul.f32 %v5788_v24, %v689_v27 }
 0x30a   :  { %v5235_v44 = vpop.f32.mrf.mxu0  ;;  %v5257_v47 = vpop.f32.mrf.mxu1 }
 0x30c   :  { %v5236_v46 = vpop.f32.mrf.mxu0  ;;  %v5258_v49 = vpop.f32.mrf.mxu1 }
 0x30d   :  { %v5237_v9 = vadd.f32 %v5236_v46, %v5235_v44  ;;  %v5259_v30 = vadd.f32 %v5258_v49, %v5257_v47  ;;  %v702_v44 = vadd.f32 %v700_v29, %v510_v28  ;;  %v6935_v47 = vunpack.i.l.bf16 %v6729_v37 }
 0x30e   :  { %v5238_v48 = vpop.f32.mrf.mxu0  ;;  %v5260_v52 = vpop.f32.mrf.mxu1 }
 0x30f   :  { %v876_v21 = vadd.f32 %v5237_v9, %v4806_v13  ;;  %v1066_v45 = vadd.f32 %v5259_v30, %v4823_v34  ;;  %v6933_v9 = vunpack.i.h.bf16 %v6729_v37 }
 0x310   :  { %v5239_v51 = vpop.f32.mrf.mxu0  ;;  %v5261_v54 = vpop.f32.mrf.mxu1 }
 0x311   :  { %v5240_v26 = vadd.f32 %v5239_v51, %v5238_v48  ;;  %v890_v38 = vmul.f32 %v5793_v20, %v876_v21  ;;  %v5262_v42 = vadd.f32 %v5261_v54, %v5260_v52 }
 0x313   :  { %v879_v35 = vadd.f32 %v5240_v26, %v4806_v13  ;;  %v1080_v13 = vmul.f32 %v6936_v39, %v1066_v45  ;;  %v6769_v45 = vpop.permute.xlu0 %5827 }
 0x315   :  { %v891_v51 = vmul.f32 %v5794_v59, %v879_v35  ;;  %v6930_v35 = vunpack.i.h.bf16 %v6744_v6 }
 0x32a   :  { %v5279_v53 = vpop.f32.mrf.mxu0 }
 0x32b   :  { %v5301_v56 = vpop.f32.mrf.mxu1 }
 0x32c   :  { %v5280_v55 = vpop.f32.mrf.mxu0 }
 0x32d   :  { %v5302_v58 = vpop.f32.mrf.mxu1  ;;  %v5281_v31 = vadd.f32 %v5280_v55, %v5279_v53  ;;  %v6741_v53 = vpop.permute.xlu1 %5815  ;;  %v892_v55 = vadd.f32 %v890_v38, %v702_v44  ;;  %v4891_v38 = vld [vmem:[#allocation14 + $0x7] ss:$0 sm:$0xff]  ;;  %v4908_v44 = vld [vmem:[#allocation14 + $0x8] ss:$0 sm:$0xff] }
 0x32e   :  { %v5282_v57 = vpop.f32.mrf.mxu0  ;;  %v5303_v4 = vadd.f32 %v5302_v58, %v5301_v56  ;;  %v6932_v56 = vunpack.i.l.bf16 %v6744_v6  ;;  %v6931_v25 = vunpack.i.l.bf16 %v6741_v53 }
 0x32f   :  { %v6701_v61 = vpop.f32.mrf.mxu1  ;;  %v1256_v46 = vadd.f32 %v5281_v31, %v4840_v36 }
 0x330   :  { %v5283_v60 = vpop.f32.mrf.mxu0  ;;  %v1446_v21 = vadd.f32 %v5303_v4, %v4857_v7 }
 0x331   :  { %v6705_v1 = vpop.f32.mrf.mxu1  ;;  %v5284_v43 = vadd.f32 %v5283_v60, %v5282_v57  ;;  %v703_v57 = vadd.f32 %v701_v41, %v511_v40  ;;  %v1069_v60 = vadd.f32 %v5262_v42, %v4823_v34  ;;  %v1270_v15 = vmul.f32 %v6935_v47, %v1256_v46  ;;  %v6759_v31 = vpop.permute.xlu1 %5821 }
 0x332   :  { %v5306_v58 = vadd.f32 %v6705_v1, %v6701_v61  ;;  %v6929_v61 = vunpack.i.h.bf16 %v6741_v53  ;;  %v1460_v42 = vmul.f32 %v6932_v56, %v1446_v21 }
 0x333   :  { %v1259_v11 = vadd.f32 %v5284_v43, %v4840_v36  ;;  %v893_v26 = vadd.f32 %v891_v51, %v703_v57  ;;  %v1081_v29 = vmul.f32 %v6934_v50, %v1069_v60 }
 0x334   :  { %v1449_v36 = vadd.f32 %v5306_v58, %v4857_v7  ;;  %v6926_v7 = vunpack.i.l.bf16 %v6769_v45 }
 0x335   :  { %v1271_v30 = vmul.f32 %v6933_v9, %v1259_v11 }
 0x34a   :  { %v5323_v62 = vpop.f32.mrf.mxu0 }
 0x34b   :  { %v6709_v5 = vpop.f32.mrf.mxu1 }
 0x34c   :  { %v5324_v2 = vpop.f32.mrf.mxu0 }
 0x34d   :  { %v6715_v18 = vpop.f32.mrf.mxu1  ;;  %v5325_v52 = vadd.f32 %v5324_v2, %v5323_v62  ;;  %v1082_v2 = vadd.f32 %v1080_v13, %v892_v55 }
 0x34e   :  { %v5326_v10 = vpop.f32.mrf.mxu0  ;;  %v5347_v1 = vadd.f32 %v6715_v18, %v6709_v5  ;;  %v6772_v5 = vpop.permute.xlu1 %5833 }
 0x34f   :  { %v6726_v32 = vpop.f32.mrf.mxu1  ;;  %v1636_v27 = vadd.f32 %v5325_v52, %v4874_v12  ;;  %v1272_v34 = vadd.f32 %v1270_v15, %v1082_v2  ;;  %v4925_v2 = vld [vmem:[#allocation14 + $0x9] ss:$0 sm:$0xff] }
 0x350   :  { %v5327_v22 = vpop.f32.mrf.mxu0  ;;  %v1826_v52 = vadd.f32 %v5347_v1, %v4891_v38  ;;  %v6924_v1 = vunpack.i.l.bf16 %v6772_v5 }
 0x351   :  { %v5349_v48 = vpop.f32.mrf.mxu1  ;;  %v5328_v62 = vadd.f32 %v5327_v22, %v5326_v10  ;;  %v1083_v22 = vadd.f32 %v1081_v29, %v893_v26  ;;  %v1650_v43 = vmul.f32 %v6931_v25, %v1636_v27  ;;  %v1462_v4 = vadd.f32 %v1460_v42, %v1272_v34 }
 0x352   :  { %v5350_v55 = vadd.f32 %v5349_v48, %v6726_v32  ;;  %v6925_v32 = vunpack.i.h.bf16 %v6769_v45  ;;  %v6782_v58 = vpop.permute.xlu1 %5839 }
 0x353   :  { %v1639_v40 = vadd.f32 %v5328_v62, %v4874_v12  ;;  %v1273_v51 = vadd.f32 %v1271_v30, %v1083_v22  ;;  %v1652_v11 = vadd.f32 %v1650_v43, %v1462_v4  ;;  %v6927_v12 = vunpack.i.h.bf16 %v6759_v31 }
 0x354   :  { %v1829_v15 = vadd.f32 %v5350_v55, %v4891_v38  ;;  %v6921_v55 = vunpack.i.h.bf16 %v6782_v58 }
 0x355   :  { %v1651_v57 = vmul.f32 %v6929_v61, %v1639_v40 }
 0x36a   :  { %v5367_v33 = vpop.f32.mrf.mxu0 }
 0x36b   :  { %v5389_v54 = vpop.f32.mrf.mxu1 }
 0x36c   :  { %v5368_v49 = vpop.f32.mrf.mxu0 }
 0x36d   :  { %v5390_v28 = vpop.f32.mrf.mxu1  ;;  %v5369_v41 = vadd.f32 %v5368_v49, %v5367_v33  ;;  %v6928_v33 = vunpack.i.l.bf16 %v6759_v31  ;;  %v1461_v49 = vmul.f32 %v6930_v35, %v1449_v36 }
 0x36e   :  { %v5370_v16 = vpop.f32.mrf.mxu0 }
 0x36f   :  { %v5392_v46 = vpop.f32.mrf.mxu1  ;;  %v2016_v60 = vadd.f32 %v5369_v41, %v4908_v44  ;;  %v1463_v13 = vadd.f32 %v1461_v49, %v1273_v51  ;;  %v1840_v62 = vmul.f32 %v6928_v33, %v1826_v52  ;;  %v6923_v41 = vunpack.i.h.bf16 %v6772_v5 }
 0x370   :  { %v5371_v10 = vpop.f32.mrf.mxu0 }
 0x371   :  { %v5372_v18 = vadd.f32 %v5371_v10, %v5370_v16  ;;  %v5393_v48 = vpop.f32.mrf.mxu1  ;;  %v5391_v16 = vadd.f32 %v5390_v28, %v5389_v54  ;;  %v1653_v27 = vadd.f32 %v1651_v57, %v1463_v13  ;;  %v2030_v29 = vmul.f32 %v6926_v7, %v2016_v60  ;;  %v4942_v10 = vld [vmem:[#allocation14 + $0xa] ss:$0 sm:$0xff]  ;;  %v4994_v7 = vld [vmem:[#allocation14 + $0xd] ss:$0 sm:$0xff] }
 0x372   :  { %v5394_v30 = vadd.f32 %v5393_v48, %v5392_v46  ;;  %v1842_v34 = vadd.f32 %v1840_v62, %v1652_v11  ;;  %v6922_v54 = vunpack.i.l.bf16 %v6782_v58  ;;  %v1841_v28 = vmul.f32 %v6927_v12, %v1829_v15 }
 0x373   :  { %v2019_v26 = vadd.f32 %v5372_v18, %v4908_v44  ;;  %v2206_v36 = vadd.f32 %v5391_v16, %v4925_v2 }
 0x374   :  { %v1843_v43 = vadd.f32 %v1841_v28, %v1653_v27  ;;  %v2032_v44 = vadd.f32 %v2030_v29, %v1842_v34  ;;  %v2209_v46 = vadd.f32 %v5394_v30, %v4925_v2  ;;  %v6025_v29 = vld [vmem:[#allocation13 + $0x5b8] sm:$0xff]   ;;  %v6027_v30 = vld [vmem:[#allocation13 + $0x5f0] sm:$0xff]   ;;  %v6033_v28 = vld [vmem:[#allocation13 + $0x5a8] sm:$0xff]  }
 0x375   :  { %v2031_v38 = vmul.f32 %v6925_v32, %v2019_v26  ;;  %v2220_v4 = vmul.f32 %v6924_v1, %v2206_v36  ;;  %v6216_v34 = vld [vmem:[#allocation5] sm:$0xff]  }
 0x376   :  { %v2221_v60 = vmul.f32 %v6923_v41, %v2209_v46  ;;  %v6035_v36 = vld [vmem:[#allocation13 + $0x5e0] sm:$0xff]   ;;  %v6047_v46 = vld [vmem:[#allocation13 + $0x5c8] sm:$0xff]  }
 0x377   :  { %v2033_v52 = vadd.f32 %v2031_v38, %v1843_v43  ;;  %v2222_v11 = vadd.f32 %v2220_v4, %v2032_v44  ;;  %v6037_v38 = vld [vmem:[#allocation13 + $0x5a0] sm:$0xff]   ;;  %v6043_v43 = vld [vmem:[#allocation13 + $0x5d0] sm:$0xff]  }
 0x378   :  { %v6045_v44 = vld [vmem:[#allocation13 + $0x590] sm:$0xff]   ;;  %v6052_v4 = vld [vmem:[#allocation13 + $0x640] sm:$0xff]  }
 0x379   :  { %v2223_v13 = vadd.f32 %v2221_v60, %v2033_v52  ;;  %v6053_v52 = vld [vmem:[#allocation13 + $0x580] sm:$0xff]   ;;  %5455 = vmatprep.subr.bf16.mxu0 %v6052_v4  ;;  %v6056_v60 = vld [vmem:[#allocation13 + $0x778] sm:$0xff]   ;;  %v6076_v4 = vld [vmem:[#allocation13 + $0x750] sm:$0xff]  }
 0x38a   :  { %v5411_v21 = vpop.f32.mrf.mxu0 }
 0x38c   :  { %v5412_v22 = vpop.f32.mrf.mxu0 }
 0x38d   :  { %v5413_v40 = vadd.f32 %v5412_v22, %v5411_v21  ;;  %v6023_v21 = vld [vmem:[#allocation13 + $0x5f8] sm:$0xff]   ;;  %v6031_v22 = vld [vmem:[#allocation13 + $0x5e8] sm:$0xff]  }
 0x38e   :  { %v5414_v42 = vpop.f32.mrf.mxu0 }
 0x38f   :  { %v2396_v51 = vadd.f32 %v5413_v40, %v4942_v10  ;;  %v6039_v40 = vld [vmem:[#allocation13 + $0x5d8] sm:$0xff]  }
 0x390   :  { %v5415_v18 = vpop.f32.mrf.mxu0 }
 0x391   :  { %v2410_v49 = vmul.f32 %v6922_v54, %v2396_v51  ;;  %v5416_v57 = vadd.f32 %v5415_v18, %v5414_v42  ;;  %v6041_v42 = vld [vmem:[#allocation13 + $0x598] sm:$0xff]   ;;  %v6049_v51 = vld [vmem:[#allocation13 + $0x588] sm:$0xff]   ;;  %v6051_v18 = vld [vmem:[#allocation13 + $0x5c0] sm:$0xff]  }
 0x393   :  { %v2399_v48 = vadd.f32 %v5416_v57, %v4942_v10  ;;  %v2412_v15 = vadd.f32 %v2410_v49, %v2222_v11  ;;  %v6029_v10 = vld [vmem:[#allocation13 + $0x5b0] sm:$0xff]   ;;  %v6054_v49 = vld [vmem:[#allocation13 + $0x600] sm:$0xff]   ;;  %v6055_v57 = vld [vmem:[#allocation13 + $0x6f8] sm:$0xff]  }
 0x394   :  { %5456 = vmatpush3.bf16.msra.mxu0 %v6054_v49  ;;  %v6078_v49 = vld [vmem:[#allocation13 + $0x710] sm:$0xff]  }
 0x395   :  { %v2411_v16 = vmul.f32 %v6921_v55, %v2399_v48  ;;  %v2414_v62 = vmax.f32 %v2412_v15, 0.0  ;;  %5485 = vmatprep.subr.bf16.mxu0 %v6056_v60  ;;  %v6057_v15 = vld [vmem:[#allocation13 + $0x6b8] sm:$0xff]   ;;  %v6080_v60 = vld [vmem:[#allocation13 + $0x748] sm:$0xff]  }
 0x396   :  { %v4977_v55 = vld [vmem:[#allocation14 + $0xc] ss:$0 sm:$0xff] }
 0x397   :  { %v2413_v26 = vadd.f32 %v2411_v16, %v2223_v13  ;;  %v6058_v16 = vld [vmem:[#allocation13 + $0x738] sm:$0xff]  }
 0x399   :  { %v2415_v2 = vmax.f32 %v2413_v26, 0.0 }
 0x39b   :  { %v6804_v27 = vpack.c.bf16 %v2415_v2, %v2414_v62  ;;  %v6059_v2 = vld [vmem:[#allocation13 + $0x6f0] sm:$0xff]  }
 0x39d   :  { %5694 = vmatpush3.bf16.msra.mxu1 %v6804_v27  ;;  %2810 = vmatprep.mubr.bf16.mxu0 %v6804_v27 }
 0x39e   :  { %5419 = vmatprep.subr.bf16.mxu1 %v6023_v21  ;;  %v6060_v21 = vld [vmem:[#allocation13 + $0x770] sm:$0xff]  }
 0x3a0   :  { %5696 = vmatmul.mubr.msk.bf16.vlgmr.msra.gmra.mxu1 %vm222_vm1, %v6216_v34  ;;  %v6063_v34 = vld [vmem:[#allocation13 + $0x6e8] sm:$0xff]  }
 0x3a1   :  { %2628 = vmatprep.mubr.bf16.mxu1 %v6804_v27  ;;  %5420 = vmatpush3.bf16.msra.mxu1 %v6025_v29  ;;  %v6061_v29 = vld [vmem:[#allocation13 + $0x6b0] sm:$0xff]  }
 0x3a2   :  { %5421 = vmatprep.subr.bf16.mxu1 %v6027_v30  ;;  %v6062_v30 = vld [vmem:[#allocation13 + $0x730] sm:$0xff]  }
 0x3a5   :  { %5422 = vmatpush3.bf16.msra.mxu1 %v6029_v10  ;;  %v6064_v10 = vld [vmem:[#allocation13 + $0x768] sm:$0xff]  }
 0x3a6   :  { %5423 = vmatprep.subr.bf16.mxu1 %v6031_v22  ;;  %v6065_v22 = vld [vmem:[#allocation13 + $0x6a8] sm:$0xff]  }
 0x3a9   :  { %5424 = vmatpush3.bf16.msra.mxu1 %v6033_v28  ;;  %v6066_v28 = vld [vmem:[#allocation13 + $0x728] sm:$0xff]  }
 0x3aa   :  { %5425 = vmatprep.subr.bf16.mxu1 %v6035_v36  ;;  %v6067_v36 = vld [vmem:[#allocation13 + $0x6e0] sm:$0xff]  }
 0x3ad   :  { %5426 = vmatpush3.bf16.msra.mxu1 %v6037_v38  ;;  %v6068_v38 = vld [vmem:[#allocation13 + $0x760] sm:$0xff]  }
 0x3ae   :  { %5427 = vmatprep.subr.bf16.mxu1 %v6039_v40  ;;  %v6069_v40 = vld [vmem:[#allocation13 + $0x6a0] sm:$0xff]  }
 0x3b1   :  { %5428 = vmatpush3.bf16.msra.mxu1 %v6041_v42  ;;  %v6070_v42 = vld [vmem:[#allocation13 + $0x720] sm:$0xff]  }
 0x3b2   :  { %5429 = vmatprep.subr.bf16.mxu1 %v6043_v43  ;;  %v6071_v43 = vld [vmem:[#allocation13 + $0x6d8] sm:$0xff]  }
 0x3b5   :  { %5430 = vmatpush3.bf16.msra.mxu1 %v6045_v44  ;;  %v6072_v44 = vld [vmem:[#allocation13 + $0x758] sm:$0xff]  }
 0x3b6   :  { %5431 = vmatprep.subr.bf16.mxu1 %v6047_v46  ;;  %v6073_v46 = vld [vmem:[#allocation13 + $0x698] sm:$0xff]  }
 0x3b9   :  { %5432 = vmatpush3.bf16.msra.mxu1 %v6049_v51  ;;  %v6074_v51 = vld [vmem:[#allocation13 + $0x718] sm:$0xff]  }
 0x3ba   :  { %5433 = vmatprep.subr.bf16.mxu1 %v6051_v18  ;;  %v6075_v18 = vld [vmem:[#allocation13 + $0x6d0] sm:$0xff]  }
 0x3bd   :  { %5434 = vmatpush3.bf16.msra.mxu1 %v6053_v52  ;;  %v6077_v52 = vld [vmem:[#allocation13 + $0x690] sm:$0xff]  }
 0x3be   :  { %5463 = vmatprep.subr.bf16.mxu1 %v6055_v57  ;;  %v6079_v57 = vld [vmem:[#allocation13 + $0x6c8] sm:$0xff]  }
 0x460   :  { %v2451_v11 = vpop.f32.mrf.mxu1 }
 0x462   :  { %v5697_v48 = vpop.f32.mrf.mxu1 }
 0x463   :  { %v6082_v48 = vld [vmem:[#allocation13 + $0x708] sm:$0xff]  }
 0x464   :  { %v2454_v13 = vpop.f32.mrf.mxu1 }
 0x465   :  { %v6810_v26 = vpack.c.bf16 %v2454_v13, %v2451_v11  ;;  %v6081_v11 = vld [vmem:[#allocation13 + $0x688] sm:$0xff]   ;;  %v6083_v13 = vld [vmem:[#allocation13 + $0x6c0] sm:$0xff]  }
 0x466   :  { %v5698_v62 = vpop.f32.mrf.mxu1 }
 0x467   :  { %2629 = vmatmul.mubr.bf16.vlgmr.msra.gmra.mxu1 %v6810_v26  ;;  %2811 = vmatmul.mubr.bf16.vlgmr.msra.gmra.mxu0 %v6810_v26  ;;  %v6086_v62 = vld [vmem:[#allocation13 + $0x700] sm:$0xff]  }
 0x468   :  { %5464 = vmatpush3.bf16.msra.mxu1 %v6057_v15  ;;  %5486 = vmatpush3.bf16.msra.mxu0 %v6058_v16  ;;  %v6084_v15 = vld [vmem:[#allocation13 + $0x740] sm:$0xff]  }
 0x469   :  { %2992 = vmatprep.mubr.bf16.mxu1 %v6804_v27  ;;  %3174 = vmatprep.mubr.bf16.mxu0 %v6804_v27  ;;  %v6085_v16 = vld [vmem:[#allocation13 + $0x680] sm:$0xff]  }
 0x46a   :  { %5465 = vmatprep.subr.bf16.mxu1 %v6059_v2  ;;  %5487 = vmatprep.subr.bf16.mxu0 %v6060_v21  ;;  %v6087_v2 = vld [vmem:[#allocation13 + $0x7f8] sm:$0xff]  }
 0x46b   :  { %v6088_v21 = vld [vmem:[#allocation13 + $0x878] sm:$0xff]  }
 0x46c   :  { %5466 = vmatpush3.bf16.msra.mxu1 %v6061_v29  ;;  %5488 = vmatpush3.bf16.msra.mxu0 %v6062_v30  ;;  %v6089_v29 = vld [vmem:[#allocation13 + $0x7b8] sm:$0xff]  }
 0x46d   :  { %5467 = vmatprep.subr.bf16.mxu1 %v6063_v34  ;;  %5489 = vmatprep.subr.bf16.mxu0 %v6064_v10  ;;  %v6090_v30 = vld [vmem:[#allocation13 + $0x838] sm:$0xff]   ;;  %v6091_v34 = vld [vmem:[#allocation13 + $0x7f0] sm:$0xff]  }
 0x46e   :  { %v6092_v10 = vld [vmem:[#allocation13 + $0x870] sm:$0xff]  }
 0x470   :  { %5468 = vmatpush3.bf16.msra.mxu1 %v6065_v22  ;;  %5490 = vmatpush3.bf16.msra.mxu0 %v6066_v28  ;;  %v6093_v22 = vld [vmem:[#allocation13 + $0x7b0] sm:$0xff]  }
 0x471   :  { %5469 = vmatprep.subr.bf16.mxu1 %v6067_v36  ;;  %5491 = vmatprep.subr.bf16.mxu0 %v6068_v38  ;;  %v6094_v28 = vld [vmem:[#allocation13 + $0x830] sm:$0xff]   ;;  %v6095_v36 = vld [vmem:[#allocation13 + $0x7e8] sm:$0xff]  }
 0x472   :  { %v6096_v38 = vld [vmem:[#allocation13 + $0x868] sm:$0xff]  }
 0x474   :  { %5470 = vmatpush3.bf16.msra.mxu1 %v6069_v40  ;;  %5492 = vmatpush3.bf16.msra.mxu0 %v6070_v42  ;;  %v6097_v40 = vld [vmem:[#allocation13 + $0x7a8] sm:$0xff]  }
 0x475   :  { %5471 = vmatprep.subr.bf16.mxu1 %v6071_v43  ;;  %5493 = vmatprep.subr.bf16.mxu0 %v6072_v44  ;;  %v6098_v42 = vld [vmem:[#allocation13 + $0x828] sm:$0xff]   ;;  %v6099_v43 = vld [vmem:[#allocation13 + $0x7e0] sm:$0xff]  }
 0x476   :  { %v6100_v44 = vld [vmem:[#allocation13 + $0x860] sm:$0xff]  }
 0x478   :  { %5472 = vmatpush3.bf16.msra.mxu1 %v6073_v46  ;;  %5494 = vmatpush3.bf16.msra.mxu0 %v6074_v51  ;;  %v6101_v46 = vld [vmem:[#allocation13 + $0x7a0] sm:$0xff]  }
 0x479   :  { %5473 = vmatprep.subr.bf16.mxu1 %v6075_v18  ;;  %5495 = vmatprep.subr.bf16.mxu0 %v6076_v4  ;;  %v6102_v51 = vld [vmem:[#allocation13 + $0x820] sm:$0xff]   ;;  %v6103_v18 = vld [vmem:[#allocation13 + $0x7d8] sm:$0xff]  }
 0x47a   :  { %v6104_v4 = vld [vmem:[#allocation13 + $0x858] sm:$0xff]  }
 0x47c   :  { %5474 = vmatpush3.bf16.msra.mxu1 %v6077_v52  ;;  %5496 = vmatpush3.bf16.msra.mxu0 %v6078_v49  ;;  %v6105_v52 = vld [vmem:[#allocation13 + $0x798] sm:$0xff]  }
 0x47d   :  { %5475 = vmatprep.subr.bf16.mxu1 %v6079_v57  ;;  %5497 = vmatprep.subr.bf16.mxu0 %v6080_v60  ;;  %v6106_v49 = vld [vmem:[#allocation13 + $0x818] sm:$0xff]   ;;  %v6107_v57 = vld [vmem:[#allocation13 + $0x7d0] sm:$0xff]  }
 0x47e   :  { %v6108_v60 = vld [vmem:[#allocation13 + $0x850] sm:$0xff]  }
 0x480   :  { %5476 = vmatpush3.bf16.msra.mxu1 %v6081_v11  ;;  %5498 = vmatpush3.bf16.msra.mxu0 %v6082_v48  ;;  %v6109_v11 = vld [vmem:[#allocation13 + $0x790] sm:$0xff]  }
 0x481   :  { %5477 = vmatprep.subr.bf16.mxu1 %v6083_v13  ;;  %5499 = vmatprep.subr.bf16.mxu0 %v6084_v15  ;;  %v6110_v48 = vld [vmem:[#allocation13 + $0x810] sm:$0xff]   ;;  %v6111_v13 = vld [vmem:[#allocation13 + $0x7c8] sm:$0xff]  }
 0x482   :  { %v6112_v15 = vld [vmem:[#allocation13 + $0x848] sm:$0xff]  }
 0x484   :  { %5478 = vmatpush3.bf16.msra.mxu1 %v6085_v16  ;;  %5500 = vmatpush3.bf16.msra.mxu0 %v6086_v62  ;;  %v6113_v16 = vld [vmem:[#allocation13 + $0x788] sm:$0xff]  }
 0x485   :  { %5507 = vmatprep.subr.bf16.mxu1 %v6087_v2  ;;  %5529 = vmatprep.subr.bf16.mxu0 %v6088_v21  ;;  %v6114_v62 = vld [vmem:[#allocation13 + $0x808] sm:$0xff]   ;;  %v6115_v2 = vld [vmem:[#allocation13 + $0x7c0] sm:$0xff]  }
 0x486   :  { %v6116_v21 = vld [vmem:[#allocation13 + $0x840] sm:$0xff]  }
 0x487   :  { %2993 = vmatmul.mubr.bf16.vlgmr.msra.gmra.mxu1 %v6810_v26  ;;  %3175 = vmatmul.mubr.bf16.vlgmr.msra.gmra.mxu0 %v6810_v26 }
 0x488   :  { %5508 = vmatpush3.bf16.msra.mxu1 %v6089_v29  ;;  %3356 = vmatprep.mubr.bf16.mxu1 %v6804_v27  ;;  %v6117_v29 = vld [vmem:[#allocation13 + $0x780] sm:$0xff]  }
 0x489   :  { %5530 = vmatpush3.bf16.msra.mxu0 %v6090_v30  ;;  %3538 = vmatprep.mubr.bf16.mxu0 %v6804_v27  ;;  %v6118_v30 = vld [vmem:[#allocation13 + $0x800] sm:$0xff]  }
 0x48a   :  { %5509 = vmatprep.subr.bf16.mxu1 %v6091_v34  ;;  %5531 = vmatprep.subr.bf16.mxu0 %v6092_v10  ;;  %v6119_v34 = vld [vmem:[#allocation13 + $0x8f8] sm:$0xff]  }
 0x48b   :  { %v6120_v10 = vld [vmem:[#allocation13 + $0x978] sm:$0xff]  }
 0x48c   :  { %5510 = vmatpush3.bf16.msra.mxu1 %v6093_v22  ;;  %v6121_v22 = vld [vmem:[#allocation13 + $0x8b8] sm:$0xff]  }
 0x48d   :  { %5532 = vmatpush3.bf16.msra.mxu0 %v6094_v28  ;;  %5511 = vmatprep.subr.bf16.mxu1 %v6095_v36  ;;  %v6122_v28 = vld [vmem:[#allocation13 + $0x938] sm:$0xff]   ;;  %v6123_v36 = vld [vmem:[#allocation13 + $0x8f0] sm:$0xff]  }
 0x48e   :  { %5533 = vmatprep.subr.bf16.mxu0 %v6096_v38  ;;  %v6124_v38 = vld [vmem:[#allocation13 + $0x970] sm:$0xff]  }
 0x490   :  { %5512 = vmatpush3.bf16.msra.mxu1 %v6097_v40  ;;  %v6125_v40 = vld [vmem:[#allocation13 + $0x8b0] sm:$0xff]  }
 0x491   :  { %5534 = vmatpush3.bf16.msra.mxu0 %v6098_v42  ;;  %5513 = vmatprep.subr.bf16.mxu1 %v6099_v43  ;;  %v6126_v42 = vld [vmem:[#allocation13 + $0x930] sm:$0xff]   ;;  %v6127_v43 = vld [vmem:[#allocation13 + $0x8e8] sm:$0xff]  }
 0x492   :  { %5535 = vmatprep.subr.bf16.mxu0 %v6100_v44  ;;  %v6128_v44 = vld [vmem:[#allocation13 + $0x968] sm:$0xff]  }
 0x494   :  { %5514 = vmatpush3.bf16.msra.mxu1 %v6101_v46  ;;  %v6129_v46 = vld [vmem:[#allocation13 + $0x8a8] sm:$0xff]  }
 0x495   :  { %5536 = vmatpush3.bf16.msra.mxu0 %v6102_v51  ;;  %5515 = vmatprep.subr.bf16.mxu1 %v6103_v18  ;;  %v6130_v51 = vld [vmem:[#allocation13 + $0x928] sm:$0xff]   ;;  %v6131_v18 = vld [vmem:[#allocation13 + $0x8e0] sm:$0xff]  }
 0x496   :  { %5537 = vmatprep.subr.bf16.mxu0 %v6104_v4  ;;  %v6132_v4 = vld [vmem:[#allocation13 + $0x960] sm:$0xff]  }
 0x498   :  { %5516 = vmatpush3.bf16.msra.mxu1 %v6105_v52  ;;  %v6133_v52 = vld [vmem:[#allocation13 + $0x8a0] sm:$0xff]  }
 0x499   :  { %5538 = vmatpush3.bf16.msra.mxu0 %v6106_v49  ;;  %5517 = vmatprep.subr.bf16.mxu1 %v6107_v57  ;;  %v6134_v49 = vld [vmem:[#allocation13 + $0x920] sm:$0xff]   ;;  %v6135_v57 = vld [vmem:[#allocation13 + $0x8d8] sm:$0xff]  }
 0x49a   :  { %5539 = vmatprep.subr.bf16.mxu0 %v6108_v60  ;;  %v6136_v60 = vld [vmem:[#allocation13 + $0x958] sm:$0xff]  }
 0x49c   :  { %5518 = vmatpush3.bf16.msra.mxu1 %v6109_v11  ;;  %v6137_v11 = vld [vmem:[#allocation13 + $0x898] sm:$0xff]  }
 0x49d   :  { %5540 = vmatpush3.bf16.msra.mxu0 %v6110_v48  ;;  %5519 = vmatprep.subr.bf16.mxu1 %v6111_v13  ;;  %v6138_v48 = vld [vmem:[#allocation13 + $0x918] sm:$0xff]   ;;  %v6139_v13 = vld [vmem:[#allocation13 + $0x8d0] sm:$0xff]  }
 0x49e   :  { %5541 = vmatprep.subr.bf16.mxu0 %v6112_v15  ;;  %v6140_v15 = vld [vmem:[#allocation13 + $0x950] sm:$0xff]  }
 0x4a0   :  { %5520 = vmatpush3.bf16.msra.mxu1 %v6113_v16  ;;  %v6141_v16 = vld [vmem:[#allocation13 + $0x890] sm:$0xff]  }
 0x4a1   :  { %5542 = vmatpush3.bf16.msra.mxu0 %v6114_v62  ;;  %5521 = vmatprep.subr.bf16.mxu1 %v6115_v2  ;;  %v6142_v62 = vld [vmem:[#allocation13 + $0x910] sm:$0xff]   ;;  %v6143_v2 = vld [vmem:[#allocation13 + $0x8c8] sm:$0xff]  }
 0x4a2   :  { %5543 = vmatprep.subr.bf16.mxu0 %v6116_v21  ;;  %v6144_v21 = vld [vmem:[#allocation13 + $0x948] sm:$0xff]  }
 0x4a4   :  { %5522 = vmatpush3.bf16.msra.mxu1 %v6117_v29  ;;  %v6145_v29 = vld [vmem:[#allocation13 + $0x888] sm:$0xff]  }
 0x4a5   :  { %5544 = vmatpush3.bf16.msra.mxu0 %v6118_v30  ;;  %5551 = vmatprep.subr.bf16.mxu1 %v6119_v34  ;;  %v6146_v30 = vld [vmem:[#allocation13 + $0x908] sm:$0xff]   ;;  %v6147_v34 = vld [vmem:[#allocation13 + $0x8c0] sm:$0xff]  }
 0x4a6   :  { %5573 = vmatprep.subr.bf16.mxu0 %v6120_v10  ;;  %v6148_v10 = vld [vmem:[#allocation13 + $0x940] sm:$0xff]  }
 0x4a7   :  { %3357 = vmatmul.mubr.bf16.vlgmr.msra.gmra.mxu1 %v6810_v26 }
 0x4a8   :  { %3539 = vmatmul.mubr.bf16.vlgmr.msra.gmra.mxu0 %v6810_v26  ;;  %5552 = vmatpush3.bf16.msra.mxu1 %v6121_v22  ;;  %v6149_v22 = vld [vmem:[#allocation13 + $0x880] sm:$0xff]  }
 0x4a9   :  { %3720 = vmatprep.mubr.bf16.mxu1 %v6804_v27  ;;  %5574 = vmatpush3.bf16.msra.mxu0 %v6122_v28  ;;  %v6150_v28 = vld [vmem:[#allocation13 + $0x900] sm:$0xff]  }
 0x4aa   :  { %3902 = vmatprep.mubr.bf16.mxu0 %v6804_v27  ;;  %5553 = vmatprep.subr.bf16.mxu1 %v6123_v36  ;;  %v6151_v36 = vld [vmem:[#allocation13 + $0x9f8] sm:$0xff]  }
 0x4ab   :  { %5575 = vmatprep.subr.bf16.mxu0 %v6124_v38  ;;  %v6152_v38 = vld [vmem:[#allocation13 + $0xa78] sm:$0xff]  }
 0x4ac   :  { %5554 = vmatpush3.bf16.msra.mxu1 %v6125_v40  ;;  %v6153_v40 = vld [vmem:[#allocation13 + $0x9b8] sm:$0xff]  }
 0x4ad   :  { %5576 = vmatpush3.bf16.msra.mxu0 %v6126_v42  ;;  %5555 = vmatprep.subr.bf16.mxu1 %v6127_v43  ;;  %v6154_v42 = vld [vmem:[#allocation13 + $0xa38] sm:$0xff]   ;;  %v6155_v43 = vld [vmem:[#allocation13 + $0x9f0] sm:$0xff]  }
 0x4ae   :  { %5577 = vmatprep.subr.bf16.mxu0 %v6128_v44  ;;  %v6156_v44 = vld [vmem:[#allocation13 + $0xa70] sm:$0xff]  }
 0x4b0   :  { %5556 = vmatpush3.bf16.msra.mxu1 %v6129_v46  ;;  %v6157_v46 = vld [vmem:[#allocation13 + $0x9b0] sm:$0xff]  }
 0x4b1   :  { %5578 = vmatpush3.bf16.msra.mxu0 %v6130_v51  ;;  %5557 = vmatprep.subr.bf16.mxu1 %v6131_v18  ;;  %v6158_v51 = vld [vmem:[#allocation13 + $0xa30] sm:$0xff]   ;;  %v6159_v18 = vld [vmem:[#allocation13 + $0x9e8] sm:$0xff]  }
 0x4b2   :  { %5579 = vmatprep.subr.bf16.mxu0 %v6132_v4  ;;  %v6160_v4 = vld [vmem:[#allocation13 + $0xa68] sm:$0xff]  }
 0x4b4   :  { %5558 = vmatpush3.bf16.msra.mxu1 %v6133_v52  ;;  %v6161_v52 = vld [vmem:[#allocation13 + $0x9a8] sm:$0xff]  }
 0x4b5   :  { %5580 = vmatpush3.bf16.msra.mxu0 %v6134_v49  ;;  %5559 = vmatprep.subr.bf16.mxu1 %v6135_v57  ;;  %v6162_v49 = vld [vmem:[#allocation13 + $0xa28] sm:$0xff]   ;;  %v6163_v57 = vld [vmem:[#allocation13 + $0x9e0] sm:$0xff]  }
 0x4b6   :  { %5581 = vmatprep.subr.bf16.mxu0 %v6136_v60  ;;  %v6164_v60 = vld [vmem:[#allocation13 + $0xa60] sm:$0xff]  }
 0x4b8   :  { %5560 = vmatpush3.bf16.msra.mxu1 %v6137_v11  ;;  %v6165_v11 = vld [vmem:[#allocation13 + $0x9a0] sm:$0xff]  }
 0x4b9   :  { %5582 = vmatpush3.bf16.msra.mxu0 %v6138_v48  ;;  %5561 = vmatprep.subr.bf16.mxu1 %v6139_v13  ;;  %v6166_v48 = vld [vmem:[#allocation13 + $0xa20] sm:$0xff]   ;;  %v6167_v13 = vld [vmem:[#allocation13 + $0x9d8] sm:$0xff]  }
 0x4ba   :  { %5583 = vmatprep.subr.bf16.mxu0 %v6140_v15  ;;  %v6168_v15 = vld [vmem:[#allocation13 + $0xa58] sm:$0xff]  }
 0x4bc   :  { %5562 = vmatpush3.bf16.msra.mxu1 %v6141_v16  ;;  %v6169_v16 = vld [vmem:[#allocation13 + $0x998] sm:$0xff]  }
 0x4bd   :  { %5584 = vmatpush3.bf16.msra.mxu0 %v6142_v62  ;;  %5563 = vmatprep.subr.bf16.mxu1 %v6143_v2  ;;  %v6170_v62 = vld [vmem:[#allocation13 + $0xa18] sm:$0xff]   ;;  %v6171_v2 = vld [vmem:[#allocation13 + $0x9d0] sm:$0xff]  }
 0x4be   :  { %5585 = vmatprep.subr.bf16.mxu0 %v6144_v21  ;;  %v6172_v21 = vld [vmem:[#allocation13 + $0xa50] sm:$0xff]  }
 0x4c0   :  { %5564 = vmatpush3.bf16.msra.mxu1 %v6145_v29  ;;  %v6173_v29 = vld [vmem:[#allocation13 + $0x990] sm:$0xff]  }
 0x4c1   :  { %5586 = vmatpush3.bf16.msra.mxu0 %v6146_v30  ;;  %5565 = vmatprep.subr.bf16.mxu1 %v6147_v34  ;;  %v6174_v30 = vld [vmem:[#allocation13 + $0xa10] sm:$0xff]   ;;  %v6175_v34 = vld [vmem:[#allocation13 + $0x9c8] sm:$0xff]  }
 0x4c2   :  { %5587 = vmatprep.subr.bf16.mxu0 %v6148_v10  ;;  %v6176_v10 = vld [vmem:[#allocation13 + $0xa48] sm:$0xff]  }
 0x4c4   :  { %5566 = vmatpush3.bf16.msra.mxu1 %v6149_v22  ;;  %v6177_v22 = vld [vmem:[#allocation13 + $0x988] sm:$0xff]  }
 0x4c5   :  { %5588 = vmatpush3.bf16.msra.mxu0 %v6150_v28  ;;  %5595 = vmatprep.subr.bf16.mxu1 %v6151_v36  ;;  %v6178_v28 = vld [vmem:[#allocation13 + $0xa08] sm:$0xff]   ;;  %v6179_v36 = vld [vmem:[#allocation13 + $0x9c0] sm:$0xff]  }
 0x4c6   :  { %5617 = vmatprep.subr.bf16.mxu0 %v6152_v38  ;;  %v6180_v38 = vld [vmem:[#allocation13 + $0xa40] sm:$0xff]  }
 0x4c7   :  { %3721 = vmatmul.mubr.bf16.vlgmr.msra.gmra.mxu1 %v6810_v26 }
 0x4c8   :  { %3903 = vmatmul.mubr.bf16.vlgmr.msra.gmra.mxu0 %v6810_v26  ;;  %5596 = vmatpush3.bf16.msra.mxu1 %v6153_v40  ;;  %v6181_v40 = vld [vmem:[#allocation13 + $0x980] sm:$0xff]  }
 0x4c9   :  { %4084 = vmatprep.mubr.bf16.mxu1 %v6804_v27  ;;  %5618 = vmatpush3.bf16.msra.mxu0 %v6154_v42  ;;  %v6182_v42 = vld [vmem:[#allocation13 + $0xa00] sm:$0xff]  }
 0x4ca   :  { %4266 = vmatprep.mubr.bf16.mxu0 %v6804_v27  ;;  %5597 = vmatprep.subr.bf16.mxu1 %v6155_v43  ;;  %v6183_v43 = vld [vmem:[#allocation13 + $0xaf8] sm:$0xff]  }
 0x4cb   :  { %5619 = vmatprep.subr.bf16.mxu0 %v6156_v44  ;;  %v6184_v44 = vld [vmem:[#allocation13 + $0xab8] sm:$0xff]  }
 0x4cc   :  { %5598 = vmatpush3.bf16.msra.mxu1 %v6157_v46  ;;  %v6185_v46 = vld [vmem:[#allocation13 + $0xaf0] sm:$0xff]  }
 0x4cd   :  { %5620 = vmatpush3.bf16.msra.mxu0 %v6158_v51  ;;  %5599 = vmatprep.subr.bf16.mxu1 %v6159_v18  ;;  %v6186_v51 = vld [vmem:[#allocation13 + $0xab0] sm:$0xff]   ;;  %v6187_v18 = vld [vmem:[#allocation13 + $0xae8] sm:$0xff]  }
 0x4ce   :  { %5621 = vmatprep.subr.bf16.mxu0 %v6160_v4  ;;  %v6188_v4 = vld [vmem:[#allocation13 + $0xaa8] sm:$0xff]  }
 0x4d0   :  { %5600 = vmatpush3.bf16.msra.mxu1 %v6161_v52  ;;  %v6189_v52 = vld [vmem:[#allocation13 + $0xae0] sm:$0xff]  }
 0x4d1   :  { %5622 = vmatpush3.bf16.msra.mxu0 %v6162_v49  ;;  %5601 = vmatprep.subr.bf16.mxu1 %v6163_v57  ;;  %v6190_v49 = vld [vmem:[#allocation13 + $0xaa0] sm:$0xff]   ;;  %v6191_v57 = vld [vmem:[#allocation13 + $0xad8] sm:$0xff]  }
 0x4d2   :  { %5623 = vmatprep.subr.bf16.mxu0 %v6164_v60  ;;  %v6192_v60 = vld [vmem:[#allocation13 + $0xa98] sm:$0xff]  }
 0x4d4   :  { %5602 = vmatpush3.bf16.msra.mxu1 %v6165_v11  ;;  %v6193_v11 = vld [vmem:[#allocation13 + $0xad0] sm:$0xff]  }
 0x4d5   :  { %5624 = vmatpush3.bf16.msra.mxu0 %v6166_v48  ;;  %5603 = vmatprep.subr.bf16.mxu1 %v6167_v13  ;;  %v6194_v48 = vld [vmem:[#allocation13 + $0xa90] sm:$0xff]   ;;  %v6196_v13 = vld [vmem:[#allocation13 + $0xa88] sm:$0xff]  }
 0x4d6   :  { %5625 = vmatprep.subr.bf16.mxu0 %v6168_v15  ;;  %v6197_v15 = vld [vmem:[#allocation13 + $0xac0] sm:$0xff]  }
 0x4d8   :  { %5604 = vmatpush3.bf16.msra.mxu1 %v6169_v16  ;;  %v6198_v16 = vld [vmem:[#allocation13 + $0xa80] sm:$0xff]  }
 0x4d9   :  { %5626 = vmatpush3.bf16.msra.mxu0 %v6170_v62  ;;  %5605 = vmatprep.subr.bf16.mxu1 %v6171_v2 }
 0x4da   :  { %5627 = vmatprep.subr.bf16.mxu0 %v6172_v21 }
 0x4dc   :  { %5606 = vmatpush3.bf16.msra.mxu1 %v6173_v29 }
 0x4dd   :  { %5628 = vmatpush3.bf16.msra.mxu0 %v6174_v30  ;;  %5607 = vmatprep.subr.bf16.mxu1 %v6175_v34 }
 0x4de   :  { %5629 = vmatprep.subr.bf16.mxu0 %v6176_v10 }
 0x4e0   :  { %5608 = vmatpush3.bf16.msra.mxu1 %v6177_v22 }
 0x4e1   :  { %5630 = vmatpush3.bf16.msra.mxu0 %v6178_v28  ;;  %5609 = vmatprep.subr.bf16.mxu1 %v6179_v36 }
 0x4e2   :  { %5631 = vmatprep.subr.bf16.mxu0 %v6180_v38 }
 0x4e4   :  { %5610 = vmatpush3.bf16.msra.mxu1 %v6181_v40 }
 0x4e5   :  { %5632 = vmatpush3.bf16.msra.mxu0 %v6182_v42  ;;  %5639 = vmatprep.subr.bf16.mxu1 %v6183_v43 }
 0x4e6   :  { %5699 = vmatprep.subr.bf16.mxu0 %v6919_v0 }
 0x4e7   :  { %4085 = vmatmul.mubr.bf16.vlgmr.msra.gmra.mxu1 %v6810_v26 }
 0x4e8   :  { %4267 = vmatmul.mubr.bf16.vlgmr.msra.gmra.mxu0 %v6810_v26  ;;  %5640 = vmatpush3.bf16.msra.mxu1 %v6184_v44 }
 0x4e9   :  { %4448 = vmatprep.mubr.bf16.mxu1 %v6804_v27  ;;  %5641 = vmatprep.subr.bf16.mxu1 %v6185_v46  ;;  %v6195_v27 = vld [vmem:[#allocation13 + $0xac8] sm:$0xff]  }
 0x4ea   :  { %5701 = vmatprep.mubr.msk.bf16.mxu0 %vm6510_vm0, %v6919_v0 }
 0x4ec   :  { %5642 = vmatpush3.bf16.msra.mxu1 %v6186_v51 }
 0x4ed   :  { %5643 = vmatprep.subr.bf16.mxu1 %v6187_v18 }
 0x4f0   :  { %5644 = vmatpush3.bf16.msra.mxu1 %v6188_v4 }
 0x4f1   :  { %5645 = vmatprep.subr.bf16.mxu1 %v6189_v52 }
 0x4f4   :  { %5646 = vmatpush3.bf16.msra.mxu1 %v6190_v49 }
 0x4f5   :  { %5647 = vmatprep.subr.bf16.mxu1 %v6191_v57 }
 0x4f8   :  { %5648 = vmatpush3.bf16.msra.mxu1 %v6192_v60 }
 0x4f9   :  { %5649 = vmatprep.subr.bf16.mxu1 %v6193_v11 }
 0x4fc   :  { %5650 = vmatpush3.bf16.msra.mxu1 %v6194_v48 }
 0x4fd   :  { %5651 = vmatprep.subr.bf16.mxu1 %v6195_v27 }
 0x500   :  { %5652 = vmatpush3.bf16.msra.mxu1 %v6196_v13 }
 0x501   :  { %5653 = vmatprep.subr.bf16.mxu1 %v6197_v15 }
 0x504   :  { %5654 = vmatpush3.bf16.msra.mxu1 %v6198_v16 }
 0x505   :  { %5725 = vmatprep.subr.bf16.mxu1 %v6919_v0 }
 0x507   :  { %4449 = vmatmul.mubr.bf16.vlgmr.msra.gmra.mxu1 %v6810_v26 }
 0x508   :  { %5741 = vmatprep.mubr.msk.bf16.mxu1 %vm6510_vm0, %v6919_v0  ;;  %v4960_v0 = vld [vmem:[#allocation14 + $0xb] ss:$0 sm:$0xff] }
 0x527   :  { %v5435_v62 = vpop.f32.mrf.mxu1  ;;  %v5457_v21 = vpop.f32.mrf.mxu0 }
 0x529   :  { %v5436_v2 = vpop.f32.mrf.mxu1  ;;  %v5458_v30 = vpop.f32.mrf.mxu0 }
 0x52a   :  { %v5437_v13 = vadd.f32 %v5436_v2, %v5435_v62  ;;  %v5459_v15 = vadd.f32 %v5458_v30, %v5457_v21 }
 0x52b   :  { %v5438_v29 = vpop.f32.mrf.mxu1  ;;  %v5460_v10 = vpop.f32.mrf.mxu0 }
 0x52c   :  { %v2631_v33 = vadd.f32 %v5437_v13, %v4960_v0  ;;  %v2813_v61 = vadd.f32 %v5459_v15, %v4977_v55  ;;  %v5079_v15 = vld [vmem:[#allocation14 + $0x12] ss:$0 sm:$0xff] }
 0x52d   :  { %v5439_v34 = vpop.f32.mrf.mxu1  ;;  %v5461_v28 = vpop.f32.mrf.mxu0 }
 0x52e   :  { %v5440_v54 = vadd.f32 %v5439_v34, %v5438_v29  ;;  %v5462_v41 = vadd.f32 %v5461_v28, %v5460_v10  ;;  %v2637_v62 = vmul.f32 %v5781_v14, %v2631_v33  ;;  %v2819_v2 = vmul.f32 %v5787_v17, %v2813_v61 }
 0x530   :  { %v2634_v25 = vadd.f32 %v5440_v54, %v4960_v0  ;;  %v2816_v56 = vadd.f32 %v5462_v41, %v4977_v55  ;;  %v5011_v0 = vld [vmem:[#allocation14 + $0xe] ss:$0 sm:$0xff]  ;;  %v2821_v61 = vadd.f32 %v2819_v2, %v2637_v62  ;;  %v6941_v2 = vunpack.i.l.bf16 %v6744_v6 }
 0x532   :  { %v2638_v30 = vmul.f32 %v5782_v23, %v2634_v25  ;;  %v2820_v34 = vmul.f32 %v5788_v24, %v2816_v56 }
 0x534   :  { %v2822_v23 = vadd.f32 %v2820_v34, %v2638_v30  ;;  %v5096_v30 = vld [vmem:[#allocation14 + $0x13] ss:$0 sm:$0xff]  ;;  %v6943_v34 = vunpack.i.h.bf16 %v6744_v6  ;;  %v5113_v6 = vld [vmem:[#allocation14 + $0x14] ss:$0 sm:$0xff] }
 0x547   :  { %v5479_v22 = vpop.f32.mrf.mxu1  ;;  %v5501_v38 = vpop.f32.mrf.mxu0 }
 0x549   :  { %v5480_v36 = vpop.f32.mrf.mxu1  ;;  %v5502_v42 = vpop.f32.mrf.mxu0 }
 0x54a   :  { %v5481_v1 = vadd.f32 %v5480_v36, %v5479_v22  ;;  %v5503_v21 = vadd.f32 %v5502_v42, %v5501_v38  ;;  %v5045_v36 = vld [vmem:[#allocation14 + $0x10] ss:$0 sm:$0xff] }
 0x54b   :  { %v5482_v40 = vpop.f32.mrf.mxu1  ;;  %v5504_v44 = vpop.f32.mrf.mxu0 }
 0x54c   :  { %v2995_v9 = vadd.f32 %v5481_v1, %v4994_v7  ;;  %v5028_v1 = vld [vmem:[#allocation14 + $0xf] ss:$0 sm:$0xff]  ;;  %v3177_v33 = vadd.f32 %v5503_v21, %v5011_v0  ;;  %v6942_v21 = vunpack.i.l.bf16 %v6741_v53 }
 0x54d   :  { %v5483_v43 = vpop.f32.mrf.mxu1  ;;  %v5505_v26 = vpop.f32.mrf.mxu0 }
 0x54e   :  { %v5484_v12 = vadd.f32 %v5483_v43, %v5482_v40  ;;  %v5506_v54 = vadd.f32 %v5505_v26, %v5504_v44  ;;  %v6937_v40 = vunpack.i.l.bf16 %v6717_v19  ;;  %v6939_v43 = vunpack.i.h.bf16 %v6717_v19 }
 0x550   :  { %v2998_v39 = vadd.f32 %v5484_v12, %v4994_v7  ;;  %v3001_v7 = vmul.f32 %v5793_v20, %v2995_v9  ;;  %v3180_v25 = vadd.f32 %v5506_v54, %v5011_v0  ;;  %v5062_v20 = vld [vmem:[#allocation14 + $0x11] ss:$0 sm:$0xff]  ;;  %v3183_v3 = vmul.f32 %v6937_v40, %v3177_v33 }
 0x551   :  { %v6944_v54 = vunpack.i.h.bf16 %v6741_v53  ;;  %v6946_v53 = vunpack.i.h.bf16 %v6759_v31 }
 0x552   :  { %v3002_v17 = vmul.f32 %v5794_v59, %v2998_v39  ;;  %v3003_v24 = vadd.f32 %v3001_v7, %v2821_v61  ;;  %v6938_v59 = vunpack.i.l.bf16 %v6729_v37  ;;  %v3184_v44 = vmul.f32 %v6939_v43, %v3180_v25 }
 0x554   :  { %v3004_v28 = vadd.f32 %v3002_v17, %v2822_v23  ;;  %v6945_v23 = vunpack.i.l.bf16 %v6759_v31  ;;  %v6949_v31 = vunpack.i.l.bf16 %v6772_v5 }
 0x567   :  { %v5523_v46 = vpop.f32.mrf.mxu1 }
 0x568   :  { %v5545_v18 = vpop.f32.mrf.mxu0 }
 0x569   :  { %v5524_v51 = vpop.f32.mrf.mxu1 }
 0x56a   :  { %v5546_v52 = vpop.f32.mrf.mxu0  ;;  %v5525_v29 = vadd.f32 %v5524_v51, %v5523_v46  ;;  %v6940_v46 = vunpack.i.h.bf16 %v6729_v37  ;;  %v3185_v51 = vadd.f32 %v3183_v3, %v3003_v24 }
 0x56b   :  { %v5526_v4 = vpop.f32.mrf.mxu1  ;;  %v5547_v56 = vadd.f32 %v5546_v52, %v5545_v18 }
 0x56c   :  { %v5548_v57 = vpop.f32.mrf.mxu0  ;;  %v3359_v55 = vadd.f32 %v5525_v29, %v5028_v1 }
 0x56d   :  { %v5527_v49 = vpop.f32.mrf.mxu1  ;;  %v3541_v18 = vadd.f32 %v5547_v56, %v5045_v36 }
 0x56e   :  { %v5549_v11 = vpop.f32.mrf.mxu0  ;;  %v5528_v41 = vadd.f32 %v5527_v49, %v5526_v4  ;;  %v3365_v39 = vmul.f32 %v6938_v59, %v3359_v55  ;;  %v3186_v49 = vadd.f32 %v3184_v44, %v3004_v28  ;;  %v6948_v28 = vunpack.i.h.bf16 %v6769_v45 }
 0x56f   :  { %v5550_v38 = vadd.f32 %v5549_v11, %v5548_v57  ;;  %v3547_v37 = vmul.f32 %v6941_v2, %v3541_v18  ;;  %v6205_v2 = vld [vmem:[#allocation16 + $0x10] sm:$0xff]  }
 0x570   :  { %v3362_v8 = vadd.f32 %v5528_v41, %v5028_v1 }
 0x571   :  { %v3544_v57 = vadd.f32 %v5550_v38, %v5045_v36 }
 0x572   :  { %v3366_v26 = vmul.f32 %v6940_v46, %v3362_v8  ;;  %v5130_v8 = vld [vmem:[#allocation14 + $0x15] ss:$0 sm:$0xff] }
 0x573   :  { %v3548_v0 = vmul.f32 %v6943_v34, %v3544_v57  ;;  %v6952_v57 = vunpack.i.h.bf16 %v6782_v58  ;;  %v6210_v34 = vld [vmem:[#allocation19 + $0x28] sm:$0xff]  }
 0x574   :  { %v3368_v13 = vadd.f32 %v3366_v26, %v3186_v49  ;;  %v6950_v26 = vunpack.i.h.bf16 %v6772_v5  ;;  %v6201_v5 = vld [vmem:[#allocation16 + $0x30] sm:$0xff]  }
 0x576   :  { %v3550_v7 = vadd.f32 %v3548_v0, %v3368_v13  ;;  %v6199_v13 = vld [vmem:[#allocation8] sm:$0xff]   ;;  %v6211_v0 = vld [vmem:[#allocation19 + $0x20] sm:$0xff]  }
 0x587   :  { %v5567_v60 = vpop.f32.mrf.mxu1 }
 0x588   :  { %v6838_v27 = vpop.f32.mrf.mxu0 }
 0x589   :  { %v5568_v48 = vpop.f32.mrf.mxu1 }
 0x58a   :  { %v5590_v32 = vpop.f32.mrf.mxu0  ;;  %v5569_v10 = vadd.f32 %v5568_v48, %v5567_v60  ;;  %v3367_v60 = vadd.f32 %v3365_v39, %v3185_v51 }
 0x58b   :  { %v5570_v16 = vpop.f32.mrf.mxu1  ;;  %v5591_v11 = vadd.f32 %v5590_v32, %v6838_v27 }
 0x58c   :  { %v5592_v50 = vpop.f32.mrf.mxu0  ;;  %v3723_v4 = vadd.f32 %v5569_v10, %v5062_v20  ;;  %v3549_v32 = vadd.f32 %v3547_v37, %v3367_v60  ;;  %v6947_v10 = vunpack.i.l.bf16 %v6769_v45  ;;  %v6951_v45 = vunpack.i.l.bf16 %v6782_v58  ;;  %v6202_v58 = vld [vmem:[#allocation16 + $0x28] sm:$0xff]  }
 0x58d   :  { %v5571_v35 = vpop.f32.mrf.mxu1  ;;  %v3905_v27 = vadd.f32 %v5591_v11, %v5079_v15  ;;  %v6206_v37 = vld [vmem:[#allocation16 + $0x8] sm:$0xff]  }
 0x58e   :  { %v5593_v12 = vpop.f32.mrf.mxu0  ;;  %v5572_v9 = vadd.f32 %v5571_v35, %v5570_v16  ;;  %v3729_v29 = vmul.f32 %v6942_v21, %v3723_v4  ;;  %v6207_v21 = vld [vmem:[#allocation16] sm:$0xff]  }
 0x58f   :  { %v5594_v16 = vadd.f32 %v5593_v12, %v5592_v50  ;;  %v3911_v25 = vmul.f32 %v6945_v23, %v3905_v27 }
 0x590   :  { %v3726_v35 = vadd.f32 %v5572_v9, %v5062_v20 }
 0x591   :  { %v3908_v50 = vadd.f32 %v5594_v16, %v5079_v15  ;;  %v6200_v15 = vld [vmem:[#allocation16 + $0x38] sm:$0xff]   ;;  %v6953_v16 = vmov 0.0  }
 0x592   :  { %v3730_v1 = vmul.f32 %v6944_v54, %v3726_v35  ;;  %v6212_v54 = vld [vmem:[#allocation19 + $0x18] sm:$0xff]  }
 0x593   :  { %v3912_v56 = vmul.f32 %v6946_v53, %v3908_v50  ;;  %v6213_v50 = vld [vmem:[#allocation19 + $0x10] sm:$0xff]   ;;  %v5158_v53 = vld [vmem:[#allocation20] ss:$0 sm:$0xff] }
 0x594   :  { %v3732_v61 = vadd.f32 %v3730_v1, %v3550_v7 }
 0x5a7   :  { %v5611_v47 = vpop.f32.mrf.mxu1 }
 0x5a8   :  { %v5633_v63 = vpop.f32.mrf.mxu0 }
 0x5a9   :  { %v5612_v14 = vpop.f32.mrf.mxu1 }
 0x5aa   :  { %v5634_v42 = vpop.f32.mrf.mxu0  ;;  %v5613_v62 = vadd.f32 %v5612_v14, %v5611_v47  ;;  %v3731_v14 = vadd.f32 %v3729_v29, %v3549_v32  ;;  %v6208_v29 = vld [vmem:[#allocation19 + $0x38] sm:$0xff]  }
 0x5ab   :  { %v5614_v22 = vpop.f32.mrf.mxu1  ;;  %v5635_v33 = vadd.f32 %v5634_v42, %v5633_v63  ;;  %v3914_v63 = vadd.f32 %v3912_v56, %v3732_v61  ;;  %5726 = vmatpush3.bf16.msra.mxu1 %v6208_v29 }
 0x5ac   :  { %v5636_v48 = vpop.f32.mrf.mxu0  ;;  %v4087_v47 = vadd.f32 %v5613_v62, %v5096_v30  ;;  %v3913_v20 = vadd.f32 %v3911_v25, %v3731_v14  ;;  %v6203_v62 = vld [vmem:[#allocation16 + $0x20] sm:$0xff]   ;;  %5727 = vmatprep.subr.bf16.mxu1 %v6953_v16 }
 0x5ad   :  { %v5615_v52 = vpop.f32.mrf.mxu1  ;;  %v4269_v40 = vadd.f32 %v5635_v33, %v5113_v6  ;;  %v5149_v14 = vld [vmem:[#allocation17] ss:$0 sm:$0xff] }
 0x5ae   :  { %v5616_v19 = vadd.f32 %v5615_v52, %v5614_v22  ;;  %v5637_v41 = vpop.f32.mrf.mxu0  ;;  %v4093_v22 = vmul.f32 %v6947_v10, %v4087_v47  ;;  %v6214_v47 = vld [vmem:[#allocation19 + $0x8] sm:$0xff]  }
 0x5af   :  { %v5638_v55 = vadd.f32 %v5637_v41, %v5636_v48  ;;  %v4275_v46 = vmul.f32 %v6949_v31, %v4269_v40 }
 0x5b0   :  { %v4090_v12 = vadd.f32 %v5616_v19, %v5096_v30  ;;  %v4095_v42 = vadd.f32 %v4093_v22, %v3913_v20  ;;  %v6204_v19 = vld [vmem:[#allocation16 + $0x18] sm:$0xff]  }
 0x5b1   :  { %v4272_v3 = vadd.f32 %v5638_v55, %v5113_v6  ;;  %v6209_v30 = vld [vmem:[#allocation19 + $0x30] sm:$0xff]  }
 0x5b2   :  { %v4094_v36 = vmul.f32 %v6948_v28, %v4090_v12  ;;  %v4277_v52 = vadd.f32 %v4275_v46, %v4095_v42  ;;  %5728 = vmatpush3.bf16.msra.mxu1 %v6209_v30  ;;  %v6215_v12 = vld [vmem:[#allocation19] sm:$0xff]  }
 0x5b3   :  { %v4276_v51 = vmul.f32 %v6950_v26, %v4272_v3  ;;  %5729 = vmatprep.subr.bf16.mxu1 %v6953_v16 }
 0x5b4   :  { %v4096_v43 = vadd.f32 %v4094_v36, %v3914_v63 }
 0x5b6   :  { %v4278_v49 = vadd.f32 %v4276_v51, %v4096_v43  ;;  %5730 = vmatpush3.bf16.msra.mxu1 %v6210_v34 }
 0x5b7   :  { %5731 = vmatprep.subr.bf16.mxu1 %v6953_v16 }
 0x5ba   :  { %5732 = vmatpush3.bf16.msra.mxu1 %v6211_v0 }
 0x5bb   :  { %5733 = vmatprep.subr.bf16.mxu1 %v6953_v16 }
 0x5be   :  { %5734 = vmatpush3.bf16.msra.mxu1 %v6212_v54 }
 0x5bf   :  { %5735 = vmatprep.subr.bf16.mxu1 %v6953_v16 }
 0x5c2   :  { %5736 = vmatpush3.bf16.msra.mxu1 %v6213_v50 }
 0x5c3   :  { %5737 = vmatprep.subr.bf16.mxu1 %v6953_v16 }
 0x5c6   :  { %5738 = vmatpush3.bf16.msra.mxu1 %v6214_v47 }
 0x5c7   :  { %v5655_v17 = vpop.f32.mrf.mxu1  ;;  %5739 = vmatprep.subr.bf16.mxu1 %v6953_v16 }
 0x5c9   :  { %v5656_v24 = vpop.f32.mrf.mxu1 }
 0x5ca   :  { %v5657_v38 = vadd.f32 %v5656_v24, %v5655_v17  ;;  %5740 = vmatpush3.bf16.msra.mxu1 %v6215_v12 }
 0x5cb   :  { %v5658_v9 = vpop.f32.mrf.mxu1 }
 0x5cc   :  { %v4451_v59 = vadd.f32 %v5657_v38, %v5130_v8 }
 0x5cd   :  { %v5659_v39 = vpop.f32.mrf.mxu1 }
 0x5ce   :  { %v5660_v44 = vadd.f32 %v5659_v39, %v5658_v9  ;;  %v4457_v18 = vmul.f32 %v6951_v45, %v4451_v59 }
 0x5d0   :  { %v4454_v4 = vadd.f32 %v5660_v44, %v5130_v8  ;;  %v4459_v60 = vadd.f32 %v4457_v18, %v4277_v52 }
 0x5d2   :  { %v4458_v35 = vmul.f32 %v6952_v57, %v4454_v4 }
 0x5d4   :  { %v4460_v11 = vadd.f32 %v4458_v35, %v4278_v49 }
 0x5d6   :  { %v4463_v48 = vpack.c.bf16 %v4460_v11, %v4459_v60 }
 0x5d8   :  { %5700 = vmatpush3.bf16.msra.mxu0 %v4463_v48 }
 0x5d9   :  { %5705 = vmatprep.subr.bf16.mxu0 %v6953_v16 }
 0x5db   :  { %5702 = vmatmul.mubr.msk.bf16.vlgmr.msra.gmra.mxu0 %vm222_vm1, %v6199_v13 }
 0x5dc   :  { %5706 = vmatpush3.bf16.msra.mxu0 %v6200_v15  ;;  %5721 = vmatprep.mubr.msk.bf16.mxu0 %vm6510_vm0, %v6953_v16 }
 0x5dd   :  { %5707 = vmatprep.subr.bf16.mxu0 %v6953_v16 }
 0x5e0   :  { %5708 = vmatpush3.bf16.msra.mxu0 %v6201_v5 }
 0x5e1   :  { %5709 = vmatprep.subr.bf16.mxu0 %v6953_v16 }
 0x5e4   :  { %5710 = vmatpush3.bf16.msra.mxu0 %v6202_v58 }
 0x5e5   :  { %5711 = vmatprep.subr.bf16.mxu0 %v6953_v16 }
 0x5e8   :  { %5712 = vmatpush3.bf16.msra.mxu0 %v6203_v62 }
 0x5e9   :  { %5713 = vmatprep.subr.bf16.mxu0 %v6953_v16 }
 0x5ec   :  { %5714 = vmatpush3.bf16.msra.mxu0 %v6204_v19 }
 0x5ed   :  { %5715 = vmatprep.subr.bf16.mxu0 %v6953_v16 }
 0x5f0   :  { %5716 = vmatpush3.bf16.msra.mxu0 %v6205_v2 }
 0x5f1   :  { %5717 = vmatprep.subr.bf16.mxu0 %v6953_v16 }
 0x5f4   :  { %5718 = vmatpush3.bf16.msra.mxu0 %v6206_v37 }
 0x5f5   :  { %5719 = vmatprep.subr.bf16.mxu0 %v6953_v16 }
 0x5f8   :  { %5720 = vmatpush3.bf16.msra.mxu0 %v6207_v21 }
 0x69b   :  { %v4506_v1 = vpop.f32.mrf.mxu0 }
 0x69d   :  { %v5703_v32 = vpop.f32.mrf.mxu0 }
 0x69f   :  { %v4509_v27 = vpop.f32.mrf.mxu0 }
 0x6a0   :  { %v4513_v41 = vpack.c.bf16 %v4509_v27, %v4506_v1 }
 0x6a1   :  { %v5704_v7 = vpop.f32.mrf.mxu0 }
 0x6a2   :  { %5722 = vmatmul.mubr.bf16.vlgmr.msra.gmra.mxu0 %v4513_v41 }
 0x762   :  { %v4619_v17 = vpop.f32.mrf.mxu0 }
 0x763   :  { %v4620_v33 = vadd.f32 %v5149_v14, %v4619_v17 }
 0x764   :  { %v5723_v61 = vpop.f32.mrf.mxu0 }
 0x765   :  { %v4626_v6 = vmax.f32 %v4620_v33, 0.0 }
 0x766   :  { %v4622_v55 = vpop.f32.mrf.mxu0 }
 0x767   :  { %v4623_v23 = vadd.f32 %v5149_v14, %v4622_v55 }
 0x768   :  { %v5724_v25 = vpop.f32.mrf.mxu0 }
 0x769   :  { %v4627_v8 = vmax.f32 %v4623_v23, 0.0 }
 0x76b   :  { %v4628_v24 = vpack.c.bf16 %v4627_v8, %v4626_v6 }
 0x76d   :  { %5742 = vmatmul.mubr.bf16.vlgmr.msra.gmra.mxu1 %v4628_v24 }
 0x82d   :  { %v4734_v56 = vpop.f32.mrf.mxu1 }
 0x82e   :  { %v4735_v10 = vadd.f32 %v5158_v53, %v4734_v56 }
 0x82f   :  { %v5743_v22 = vpop.f32.mrf.mxu1 }
 0x830   :  { %4741 = vst [vmem:[#allocation22] sm:$0xff] %v4735_v10 }
 0x831   :  { %v4737_v28 = vpop.f32.mrf.mxu1 }
 0x832   :  { %v4738_v36 = vadd.f32 %v5158_v53, %v4737_v28 }
 0x833   :  { %v5744_v38 = vpop.f32.mrf.mxu1 }
 0x834   :  { %4742 = vst [vmem:[#allocation22 + $0x8] sm:$0xff] %v4738_v36 }
 0x835   :  { %6468 = shalt.err (!%p6465_p8)
}
 0x836   :  { %s6523_s27 = smov 128   ;;  %s6524_s22 = smov 8  }
 0x837   :  { %4754 = dma.vmem_to_hbm [thread:$0]  %s4749_s11, 256, %s6918_s12, [#allocation4], %s6523_s27, %s6523_s27, %s6524_s22  }
 0x838   :  { %6491 = dma.done.wait [#allocation4], 256  }
 0x839   :  { %6492 = vsyncadd [#allocation4], 4294967040 }
 0x83a   :  { %4758 = vsyncpa [#allocation3], 1 }
 0x83b   :  { %4759 = vsyncpa [#allocation6], 1 }
 0x83c   :  { %4760 = vsyncpa [#allocation9], 1 }
 0x83d   :  { %4761 = vsyncpa [#allocation12], 1 }
 0x83e   :  { %4762 = vsyncpa [#allocation15], 1 }
 0x83f   :  { %4763 = vsyncpa [#allocation18], 1 }
 0x840   :  { %4764 = vsyncpa [#allocation21], 1 }
 0x841   :  { %4765 = vsyncpa [#allocation4], 1 }

</bundles_post_ra>
